<compile_context>
chip_gen: v5e
topology: v5e:2x2
jax: 0.10.0
libtpu: 0.0.40
codegen_flags: <defaults>
</compile_context>

<pallas_src>
import jax
import jax.numpy as jnp
from jax.experimental import pallas as pl
from jax.experimental.pallas import tpu as pltpu


_LANES = 1024                 # lane-dense slab width (multiple of 128)
_TM = 256                     # rows per tile -> 256*1024*4 B = 1 MiB f32 tile
_TILE_ELEMS = _TM * _LANES    # elements covered per grid step
_PALLAS_MIN_ELEMS = 4096      # below this, plain fused XLA elementwise wins


def _scale_shift_kernel(w_ref, b_ref, x_ref, o_ref):
    # w_ref (1,1) and b_ref (1,) live in SMEM; x_ref/o_ref are (TM, LANES)
    # VMEM tiles.  y = x * w + b  == x @ W.T + b for a 1x1 weight.
    o_ref[...] = x_ref[...] * w_ref[0, 0] + b_ref[0]


def linear_1x1(x, w, b):
    """x: (N, 1) f32, w: (1, 1) f32, b: (1,) f32 -> (N, 1) f32."""
    n, f = x.shape
    assert f == 1 and w.shape == (1, 1) and b.shape == (1,)

    # Tiny batches: the Pallas launch + per-grid-step overhead is strictly
    # slower than one fused XLA elementwise op.
    if n < _PALLAS_MIN_ELEMS:
        return x * w[0, 0] + b[0]

    # Lane-dense slab: flatten, pad to a whole number of (TM, LANES) tiles,
    # reshape to (rows, LANES).
    flat = x.reshape(-1)
    n_pad = pl.cdiv(n, _TILE_ELEMS) * _TILE_ELEMS
    if n_pad != n:
        flat = jnp.pad(flat, (0, n_pad - n))
    slab = flat.reshape(n_pad // _LANES, _LANES)
    rows = slab.shape[0]

    out = pl.pallas_call(
        _scale_shift_kernel,
        out_shape=jax.ShapeDtypeStruct(slab.shape, x.dtype),
        grid=(rows // _TM,),
        in_specs=[
            pl.BlockSpec(memory_space=pltpu.MemorySpace.SMEM),   # weight (1,1)
            pl.BlockSpec(memory_space=pltpu.MemorySpace.SMEM),   # bias (1,)
            pl.BlockSpec((_TM, _LANES), lambda i: (i, 0)),       # x tile
        ],
        out_specs=pl.BlockSpec((_TM, _LANES), lambda i: (i, 0)),
        compiler_params=pltpu.CompilerParams(
            dimension_semantics=("parallel",),     # shard across 2 TCs on v7x
            vmem_limit_bytes=32 * 1024 * 1024,     # ample headroom, < v7x 64 MiB
        ),
    )(w, b, slab)

    # Drop the padded tail and restore the (N, 1) layout.
    return out.reshape(-1)[:n].reshape(n, 1)


if __name__ == "__main__":
    key = jax.random.PRNGKey(0)
    kx, kw, kb, kx2 = jax.random.split(key, 4)

    # Parameters matching nn.Linear(1, 1) shapes (PyTorch init is U(-1, 1)
    # for fan_in=1; mimic that deterministically).
    w = jax.random.uniform(kw, (1, 1), jnp.float32, minval=-1.0, maxval=1.0)
    b = jax.random.uniform(kb, (1,), jnp.float32, minval=-1.0, maxval=1.0)

    # 1) Small input (module-scale): takes the plain-JAX bypass path.
    x_small = jax.random.normal(kx, (8, 1), jnp.float32)
    y_small = jax.block_until_ready(linear_1x1(x_small, w, b))
    assert y_small.shape == (8, 1)
    assert jnp.allclose(y_small, x_small @ w.T + b, atol=1e-6)

    # 2) Larger input: exercises the tiled, lane-dense Pallas kernel
    #    (including the pad-and-slice tail handling).
    n_big = 300_000
    x_big = jax.random.normal(kx2, (n_big, 1), jnp.float32)
    y_big = jax.block_until_ready(linear_1x1(x_big, w, b))
    assert y_big.shape == (n_big, 1)
    assert jnp.allclose(y_big, x_big @ w.T + b, atol=1e-5)

    print("KERNEL_OK")
</pallas_src>

<mosaic_0001>
module attributes {stable_mosaic.version = 11 : i64} {
  func.func @_scale_shift_kernel(%arg0: i32, %arg1: memref<1x1xf32, #tpu.memory_space<smem>>, %arg2: memref<1xf32, #tpu.memory_space<smem>>, %arg3: memref<256x1024xf32, #tpu.memory_space<vmem>>, %arg4: memref<256x1024xf32, #tpu.memory_space<vmem>>) attributes {dimension_semantics = [#tpu.dimension_semantics<parallel>], iteration_bounds = array<i64: 2>, scalar_prefetch = 0 : i64, scratch_operands = 0 : i64, tpu.core_type = #tpu.core_type<tc>, window_params = [{transform_indices = @transform_0, window_bounds = array<i64: 1, 1>}, {transform_indices = @transform_1, window_bounds = array<i64: 1>}, {transform_indices = @transform_2, window_bounds = array<i64: 256, 1024>}, {transform_indices = @transform_3, window_bounds = array<i64: 256, 1024>}]} {
    %c0 = arith.constant 0 : index
    %c0_0 = arith.constant 0 : index
    %0 = vector.load %arg3[%c0, %c0_0] : memref<256x1024xf32, #tpu.memory_space<vmem>>, vector<256x1024xf32>
    %c0_1 = arith.constant 0 : index
    %c0_2 = arith.constant 0 : index
    %1 = memref.load %arg1[%c0_1, %c0_2] : memref<1x1xf32, #tpu.memory_space<smem>>
    %2 = vector.broadcast %1 : f32 to vector<256x1024xf32>
    %3 = arith.mulf %0, %2 : vector<256x1024xf32>
    %c0_3 = arith.constant 0 : index
    %4 = memref.load %arg2[%c0_3] : memref<1xf32, #tpu.memory_space<smem>>
    %5 = vector.broadcast %4 : f32 to vector<256x1024xf32>
    %6 = arith.addf %3, %5 : vector<256x1024xf32>
    %c0_4 = arith.constant 0 : index
    %c0_5 = arith.constant 0 : index
    %7 = vector.load %arg4[%c0_4, %c0_5] : memref<256x1024xf32, #tpu.memory_space<vmem>>, vector<256x1024xf32>
    tpu.vector_store %arg4[%c0_4, %c0_5], %6 {strides = array<i32>} : memref<256x1024xf32, #tpu.memory_space<vmem>>, vector<256x1024xf32>,
    return
  }
  func.func @transform_0(%arg0: i32) -> (i32, i32) {
    %c0_i32 = arith.constant 0 : i32
    %c0_i32_0 = arith.constant 0 : i32
    %c0_i32_1 = arith.constant 0 : i32
    return %c0_i32, %c0_i32_0 : i32, i32
  }
  func.func @transform_1(%arg0: i32) -> i32 {
    %c0_i32 = arith.constant 0 : i32
    %c0_i32_0 = arith.constant 0 : i32
    return %c0_i32 : i32
  }
  func.func @transform_2(%arg0: i32) -> (i32, i32) {
    %c0_i32 = arith.constant 0 : i32
    %c0_i32_0 = arith.constant 0 : i32
    return %arg0, %c0_i32 : i32, i32
  }
  func.func @transform_3(%arg0: i32) -> (i32, i32) {
    %c0_i32 = arith.constant 0 : i32
    %c0_i32_0 = arith.constant 0 : i32
    return %arg0, %c0_i32 : i32, i32
  }
}

</mosaic_0001>

<bundles_post_ra>
// kernel: tpu_custom_call.1
= control target key start
LH: loop header
LB: loop body
LE: loop exit
PB: predicated region body
PF: predicated region fallthrough
CT: control target
= control target key end

     0   :  { %s2676_s0 = inlined_call_operand.<no memory space> [shape: f32[1,1], index: 0, kind: input, shape index: {}]   ;;  %s2677_s1 = inlined_call_operand.<no memory space> [shape: f32[1], index: 1, kind: input, shape index: {}]   ;;  %s2678_s2 = inlined_call_operand.hbm [shape: f32[512,1024], index: 2, kind: input, shape index: {}]   ;;  %s2679_s3 = inlined_call_operand.hbm [shape: f32[512,1024], index: 3, kind: output, shape index: {}]  }
   0x1   :  { %8 = sst [smem:[#allocation2]] %s2676_s0 }
   0x2   :  { %9 = sst [smem:[#allocation3]] %s2677_s1 }
   0x3   :  { %10 = vsyncpa [#allocation5], 0 }
   0x4   :  { %12 = vsyncpa [#allocation5 + $0x1], 0 }
   0x5   :  { %13 = vsyncpa [#allocation6], 0 }
   0x6   :  { %15 = vsyncpa [#allocation6 + $0x1], 0  ;;  %s1512_s16 = smov 0   ;;  %s1514_s17 = smov 0  }
   0x7   :  { %s1516_s18 = smov 0   ;;  %s1518_s19 = smov 0  }
   0x8 LB: > { %s1533_s0 = sadd.s32 4294967295, %s1480_s19   ;;  %s1314_s1 = sadd.s32 4294967294, %s1480_s19   ;;  %s1480_s19 = sphi %s1518_s19, %s2689_s19   ;;  %s1476_s18 = sphi %s1516_s18, %s2688_s18   ;;  %s1472_s17 = sphi %s1514_s17, %s2687_s17   ;;  %s1468_s16 = sphi %s1512_s16, %s2686_s16  }
   0x9   : > { %s1537_s20 = sadd.s32 1, %s1480_s19   ;;  %s70_s21 = sadd.s32 1, %s1476_s18 }
   0xa   : > { %s67_s22 = ssub.s32 %s1480_s19, %s1537_s20  ;;  %p77_p0 = scmp.ne.s32.totalorder %s1476_s18, %s1472_s17 }
   0xb   : > { %p68_p1 = scmp.eq.s32.totalorder %s67_s22, 0  ;;  %p78_p2 = scmp.eq.s32.totalorder %s1480_s19, 0 }
   0xc   : > { %p83_p3 = scmp.ne.s32.totalorder %s1472_s17, %s1468_s16  ;;  %p84_p4 = scmp.eq.s32.totalorder %s1533_s0, 0 }
   0xd   : > { %s1549_s23 = scalar_select %p68_p1, %s1476_s18, %s70_s21  }
   0xe   : > { %p1551_p5 = por %p78_p2, %p77_p0  ;;  %p1555_p6 = por %p84_p4, %p83_p3 }
   0xf   : > { %p107_p7 = scmp.eq.s32.totalorder %s1533_s0, 1  ;;  %p113_p8 = scmp.eq.s32.totalorder %s1314_s1, 1 }
  0x10   : > { %p1346_p10 = scmp.lt.s32.totalorder %s1480_s19, 2  ;;  %s139_s28 = sand.u32 1, %s1476_s18  }
  0x11   : > { %p1562_p11 = por %p107_p7, %p77_p0  ;;  %p1566_p12 = por %p113_p8, %p83_p3 }
  0x12   : > { %s1331_s29 = sshll.u32 %s1480_s19, 11  ;;  %s1317_s30 = sshll.u32 %s139_s28, 11 }
  0x13   : > { %s149_s6 = scalar_lea.hbm %s2678_s2, %s1331_s29  ;;  %s143_s8 = scalar_lea.vmem [#allocation4], %s1317_s30 }
  0x14   : > { %s150_s7 = sshll.u32 %s149_s6, 4  ;;  %s152_s9 = sshll.u32 %s143_s8, 4  ;;  %s151_s7 = int_to_ptr.hbm [resolvable:$true] %s150_s7  ;;  %s153_s9 = int_to_ptr.vmem [resolvable:$true] %s152_s9 }
  0x15   : > { %p1577_p13 = pnand %p1346_p10, %p1551_p5  ;;  %p1321_p0 = scmp.ge.s32.totalorder %s1480_s19, 1 }
  0x16   : > { %p160_p1 = scmp.lt.s32.totalorder %s1480_s19, 3  ;;  %s140_s11 = scalar_lea.sflag [#allocation5], %s139_s28 }
  0x17   : > { %s1384_s12 = sshra.s32 %s151_s7, 4  ;;  %p1388_p3 = pneg %p1577_p13  ;;  %s1385_s12 = int_to_ptr.hbm [resolvable:$true] %s1384_s12 }
  0x18   : > { %s1386_s13 = scalar_lea.hbm %s1385_s12, 2048  ;;  %s1391_s1 = scalar_lea.hbm %s2678_s2, 4096 }
  0x19   : > { %p1387_p2 = scmp.ne.s32.totalorder %s1385_s12, %s1386_s13  ;;  %p1392_p5 = scmp.lt.s32.totalorder %s1385_s12, %s2678_s2 }
  0x1a   : > { %p1393_p8 = scmp.lt.s32.totalorder %s1391_s1, %s1386_s13 }
  0x1b   : > { %p1389_p4 = pnand %p1388_p3, %p1387_p2 }
  0x1c   : > { %p1394_p10 = por %p1393_p8, %p1392_p5 }
  0x1d   : > { %p1390_p7 = pneg %p1389_p4 }
  0x1f   : > { %p1395_p9 = pnand %p1394_p10, %p1390_p7 }
  0x21   : > { %1398 = shalt.err (!%p1395_p9)
}
  0x22   : > { %s1482_s24 = smov 1024   ;;  %s1483_s28 = smov 64  }
  0x23   : > { %1341 = dma.hbm_to_vmem [thread:$0]  (!%p1577_p13), %s151_s7, 32768, %s153_s9, %s140_s11, %s1482_s24, %s1482_s24, %s1483_s28  }
  0x24   : > { %p161_p2 = pnand %p1321_p0, %p160_p1 }
  0x25   : > { %s1598_s29 = sand.u32 (!%p161_p2), 1, %s1472_s17  }
  0x26   : > { %164 = sbr.rel (%p161_p2) target bundleno = 314 (0x13a), region = 32  ;;  %s1322_s30 = sshll.u32 (!%p161_p2), %s1598_s29, 11 }
  0x27   : > { %s167_s4 = scalar_lea.sflag (!%p161_p2), [#allocation5], %s1598_s29  ;;  %s1604_s5 = scalar_lea.vmem (!%p161_p2), [#allocation4], %s1322_s30 }
  0x2b   : > { %1459 = dma.done.wait (%p1555_p6), %s167_s4, 32768  }
  0x2c   : > { %1461 = vsyncadd (%p1555_p6), %s167_s4, 4294934528  ;;  %s452_s6 = sld [smem:[#allocation2]]  ;;  %v196_v0 = vld [vmem:[%s1604_s5] sm:$0xff]  ;;  %v197_v2 = vld [vmem:[%s1604_s5 + $0x8] sm:$0xff]  ;;  %s1639_s25 = scalar_lea.vmem [#allocation7], %s1322_s30 }
  0x2d   : > { %s710_s7 = sld [smem:[#allocation3]]  ;;  %v198_v3 = vld [vmem:[%s1604_s5 + $0x10] sm:$0xff]  ;;  %v199_v8 = vld [vmem:[%s1604_s5 + $0x18] sm:$0xff]  ;;  %v200_v9 = vld [vmem:[%s1604_s5 + $0x20] sm:$0xff]  ;;  %s1333_s8 = sshll.u32 %s1533_s0, 11 }
  0x2e   : > { %v201_v10 = vld [vmem:[%s1604_s5 + $0x28] sm:$0xff]  ;;  %v202_v14 = vld [vmem:[%s1604_s5 + $0x30] sm:$0xff]  ;;  %v203_v15 = vld [vmem:[%s1604_s5 + $0x38] sm:$0xff]  ;;  %s1237_s10 = scalar_lea.hbm %s2679_s3, %s1333_s8  ;;  %s1238_s11 = sshll.u32 %s1639_s25, 4  ;;  %s1239_s11 = int_to_ptr.vmem [resolvable:$true] %s1238_s11 }
  0x2f   : > { %v204_v16 = vld [vmem:[%s1604_s5 + $0x40] sm:$0xff]  ;;  %v205_v21 = vld [vmem:[%s1604_s5 + $0x48] sm:$0xff]  ;;  %v206_v24 = vld [vmem:[%s1604_s5 + $0x50] sm:$0xff]  ;;  %s1240_s12 = sshll.u32 %s1237_s10, 4  ;;  %s1225_s13 = scalar_lea.sflag [#allocation6], %s1598_s29  ;;  %s1241_s12 = int_to_ptr.hbm [resolvable:$true] %s1240_s12 }
  0x30   : > { %v207_v27 = vld [vmem:[%s1604_s5 + $0x58] sm:$0xff]  ;;  %v208_v30 = vld [vmem:[%s1604_s5 + $0x60] sm:$0xff]  ;;  %v209_v33 = vld [vmem:[%s1604_s5 + $0x68] sm:$0xff]  ;;  %s1428_s14 = sshra.s32 %s1241_s12, 4  ;;  %s1434_s22 = scalar_lea.hbm %s2679_s3, 4096  ;;  %s1429_s14 = int_to_ptr.hbm [resolvable:$true] %s1428_s14 }
  0x31   : > { %v210_v36 = vld [vmem:[%s1604_s5 + $0x70] sm:$0xff]  ;;  %v211_v39 = vld [vmem:[%s1604_s5 + $0x78] sm:$0xff]  ;;  %v212_v42 = vld [vmem:[%s1604_s5 + $0x80] sm:$0xff]  ;;  %s1430_s15 = scalar_lea.hbm %s1429_s14, 2048  ;;  %p1435_p0 = scmp.lt.s32.totalorder %s1429_s14, %s2679_s3 }
  0x32   : > { %v1611_v1 = vstv %s452_s6  ;;  %v213_v45 = vld [vmem:[%s1604_s5 + $0x88] sm:$0xff]  ;;  %v214_v48 = vld [vmem:[%s1604_s5 + $0x90] sm:$0xff]  ;;  %v215_v51 = vld [vmem:[%s1604_s5 + $0x98] sm:$0xff]  ;;  %p1431_p6 = scmp.ne.s32.totalorder %s1429_s14, %s1430_s15  ;;  %p1436_p1 = scmp.lt.s32.totalorder %s1434_s22, %s1430_s15 }
  0x33   : > { %v454_v4 = vmul.f32 %v1611_v1, %v196_v0  ;;  %v1616_v5 = vstv %s710_s7  ;;  %v455_v6 = vmul.f32 %v1611_v1, %v197_v2  ;;  %v456_v7 = vmul.f32 %v1611_v1, %v198_v3  ;;  %v216_v54 = vld [vmem:[%s1604_s5 + $0xa0] sm:$0xff]  ;;  %v217_v57 = vld [vmem:[%s1604_s5 + $0xa8] sm:$0xff]  ;;  %v218_v60 = vld [vmem:[%s1604_s5 + $0xb0] sm:$0xff] }
  0x34   : > { %v457_v11 = vmul.f32 %v1611_v1, %v199_v8  ;;  %v458_v12 = vmul.f32 %v1611_v1, %v200_v9  ;;  %v459_v13 = vmul.f32 %v1611_v1, %v201_v10  ;;  %v460_v20 = vmul.f32 %v1611_v1, %v202_v14  ;;  %v219_v63 = vld [vmem:[%s1604_s5 + $0xb8] sm:$0xff]  ;;  %v220_v3 = vld [vmem:[%s1604_s5 + $0xc0] sm:$0xff]  ;;  %v222_v10 = vld [vmem:[%s1604_s5 + $0xd0] sm:$0xff]  ;;  %p1432_p9 = pnand %p1431_p6, %p1562_p11  ;;  %p1437_p3 = por %p1436_p1, %p1435_p0 }
  0x35   : > { %v712_v17 = vadd.f32 %v1616_v5, %v454_v4  ;;  %v713_v18 = vadd.f32 %v1616_v5, %v455_v6  ;;  %v714_v19 = vadd.f32 %v1616_v5, %v456_v7  ;;  %v461_v23 = vmul.f32 %v1611_v1, %v203_v15  ;;  %v221_v7 = vld [vmem:[%s1604_s5 + $0xc8] sm:$0xff] }
  0x36   : > { %v715_v22 = vadd.f32 %v1616_v5, %v457_v11  ;;  %v716_v25 = vadd.f32 %v1616_v5, %v458_v12  ;;  %v462_v26 = vmul.f32 %v1611_v1, %v204_v16  ;;  %v717_v28 = vadd.f32 %v1616_v5, %v459_v13  ;;  %v223_v13 = vld [vmem:[%s1604_s5 + $0xd8] sm:$0xff]  ;;  %v224_v16 = vld [vmem:[%s1604_s5 + $0xe0] sm:$0xff]  ;;  %p1433_p13 = pneg %p1432_p9 }
  0x37   : > { %968 = vst [vmem:[%s1639_s25] sm:$0xff] %v712_v17  ;;  %v463_v29 = vmul.f32 %v1611_v1, %v205_v21  ;;  %v718_v31 = vadd.f32 %v1616_v5, %v460_v20  ;;  %v464_v32 = vmul.f32 %v1611_v1, %v206_v24  ;;  %v719_v34 = vadd.f32 %v1616_v5, %v461_v23 }
  0x38   : > { %969 = vst [vmem:[%s1639_s25 + $0x8] sm:$0xff] %v713_v18  ;;  %v465_v35 = vmul.f32 %v1611_v1, %v207_v27  ;;  %v720_v37 = vadd.f32 %v1616_v5, %v462_v26  ;;  %v466_v38 = vmul.f32 %v1611_v1, %v208_v30  ;;  %v467_v41 = vmul.f32 %v1611_v1, %v209_v33  ;;  %p1438_p4 = pnand %p1437_p3, %p1433_p13 }
  0x39   : > { %970 = vst [vmem:[%s1639_s25 + $0x10] sm:$0xff] %v714_v19  ;;  %v721_v40 = vadd.f32 %v1616_v5, %v463_v29  ;;  %v722_v43 = vadd.f32 %v1616_v5, %v464_v32  ;;  %v468_v44 = vmul.f32 %v1611_v1, %v210_v36  ;;  %v469_v47 = vmul.f32 %v1611_v1, %v211_v39  ;;  %v225_v19 = vld [vmem:[%s1604_s5 + $0xe8] sm:$0xff] }
  0x3a   : > { %971 = vst [vmem:[%s1639_s25 + $0x18] sm:$0xff] %v715_v22  ;;  %v723_v46 = vadd.f32 %v1616_v5, %v465_v35  ;;  %v724_v49 = vadd.f32 %v1616_v5, %v466_v38  ;;  %v470_v50 = vmul.f32 %v1611_v1, %v212_v42  ;;  %v725_v52 = vadd.f32 %v1616_v5, %v467_v41  ;;  %v226_v22 = vld [vmem:[%s1604_s5 + $0xf0] sm:$0xff] }
  0x3b   : > { %972 = vst [vmem:[%s1639_s25 + $0x20] sm:$0xff] %v716_v25  ;;  %v471_v53 = vmul.f32 %v1611_v1, %v213_v45  ;;  %v726_v55 = vadd.f32 %v1616_v5, %v468_v44  ;;  %v472_v56 = vmul.f32 %v1611_v1, %v214_v48  ;;  %v727_v58 = vadd.f32 %v1616_v5, %v469_v47  ;;  %v227_v25 = vld [vmem:[%s1604_s5 + $0xf8] sm:$0xff] }
  0x3c   : > { %973 = vst [vmem:[%s1639_s25 + $0x28] sm:$0xff] %v717_v28  ;;  %v473_v59 = vmul.f32 %v1611_v1, %v215_v51  ;;  %v728_v61 = vadd.f32 %v1616_v5, %v470_v50  ;;  %v474_v62 = vmul.f32 %v1611_v1, %v216_v54  ;;  %v475_v2 = vmul.f32 %v1611_v1, %v217_v57  ;;  %v228_v28 = vld [vmem:[%s1604_s5 + $0x100] sm:$0xff] }
  0x3d   : > { %974 = vst [vmem:[%s1639_s25 + $0x30] sm:$0xff] %v718_v31  ;;  %v729_v0 = vadd.f32 %v1616_v5, %v471_v53  ;;  %v730_v4 = vadd.f32 %v1616_v5, %v472_v56  ;;  %v476_v6 = vmul.f32 %v1611_v1, %v218_v60  ;;  %v477_v9 = vmul.f32 %v1611_v1, %v219_v63  ;;  %v229_v31 = vld [vmem:[%s1604_s5 + $0x108] sm:$0xff] }
  0x3e   : > { %975 = vst [vmem:[%s1639_s25 + $0x38] sm:$0xff] %v719_v34  ;;  %v731_v8 = vadd.f32 %v1616_v5, %v473_v59  ;;  %v732_v11 = vadd.f32 %v1616_v5, %v474_v62  ;;  %v478_v12 = vmul.f32 %v1611_v1, %v220_v3  ;;  %v733_v14 = vadd.f32 %v1616_v5, %v475_v2  ;;  %v230_v34 = vld [vmem:[%s1604_s5 + $0x110] sm:$0xff] }
  0x3f   : > { %976 = vst [vmem:[%s1639_s25 + $0x40] sm:$0xff] %v720_v37  ;;  %v479_v15 = vmul.f32 %v1611_v1, %v221_v7  ;;  %v734_v17 = vadd.f32 %v1616_v5, %v476_v6  ;;  %v480_v18 = vmul.f32 %v1611_v1, %v222_v10  ;;  %v735_v20 = vadd.f32 %v1616_v5, %v477_v9  ;;  %v231_v37 = vld [vmem:[%s1604_s5 + $0x118] sm:$0xff] }
  0x40   : > { %977 = vst [vmem:[%s1639_s25 + $0x48] sm:$0xff] %v721_v40  ;;  %v481_v21 = vmul.f32 %v1611_v1, %v223_v13  ;;  %v736_v23 = vadd.f32 %v1616_v5, %v478_v12  ;;  %v482_v24 = vmul.f32 %v1611_v1, %v224_v16  ;;  %v483_v27 = vmul.f32 %v1611_v1, %v225_v19  ;;  %v232_v40 = vld [vmem:[%s1604_s5 + $0x120] sm:$0xff] }
  0x41   : > { %978 = vst [vmem:[%s1639_s25 + $0x50] sm:$0xff] %v722_v43  ;;  %v737_v26 = vadd.f32 %v1616_v5, %v479_v15  ;;  %v738_v29 = vadd.f32 %v1616_v5, %v480_v18  ;;  %v484_v30 = vmul.f32 %v1611_v1, %v226_v22  ;;  %v485_v33 = vmul.f32 %v1611_v1, %v227_v25  ;;  %v233_v43 = vld [vmem:[%s1604_s5 + $0x128] sm:$0xff] }
  0x42   : > { %979 = vst [vmem:[%s1639_s25 + $0x58] sm:$0xff] %v723_v46  ;;  %v739_v32 = vadd.f32 %v1616_v5, %v481_v21  ;;  %v740_v35 = vadd.f32 %v1616_v5, %v482_v24  ;;  %v486_v36 = vmul.f32 %v1611_v1, %v228_v28  ;;  %v741_v38 = vadd.f32 %v1616_v5, %v483_v27  ;;  %v234_v46 = vld [vmem:[%s1604_s5 + $0x130] sm:$0xff] }
  0x43   : > { %980 = vst [vmem:[%s1639_s25 + $0x60] sm:$0xff] %v724_v49  ;;  %v487_v39 = vmul.f32 %v1611_v1, %v229_v31  ;;  %v742_v41 = vadd.f32 %v1616_v5, %v484_v30  ;;  %v488_v42 = vmul.f32 %v1611_v1, %v230_v34  ;;  %v743_v44 = vadd.f32 %v1616_v5, %v485_v33  ;;  %v235_v49 = vld [vmem:[%s1604_s5 + $0x138] sm:$0xff] }
  0x44   : > { %981 = vst [vmem:[%s1639_s25 + $0x68] sm:$0xff] %v725_v52  ;;  %v489_v45 = vmul.f32 %v1611_v1, %v231_v37  ;;  %v744_v47 = vadd.f32 %v1616_v5, %v486_v36  ;;  %v490_v48 = vmul.f32 %v1611_v1, %v232_v40  ;;  %v491_v51 = vmul.f32 %v1611_v1, %v233_v43  ;;  %v236_v52 = vld [vmem:[%s1604_s5 + $0x140] sm:$0xff] }
  0x45   : > { %982 = vst [vmem:[%s1639_s25 + $0x70] sm:$0xff] %v726_v55  ;;  %v745_v50 = vadd.f32 %v1616_v5, %v487_v39  ;;  %v746_v53 = vadd.f32 %v1616_v5, %v488_v42  ;;  %v492_v54 = vmul.f32 %v1611_v1, %v234_v46  ;;  %v237_v55 = vld [vmem:[%s1604_s5 + $0x148] sm:$0xff]  ;;  %v493_v57 = vmul.f32 %v1611_v1, %v235_v49 }
  0x46   : > { %983 = vst [vmem:[%s1639_s25 + $0x78] sm:$0xff] %v727_v58  ;;  %v747_v56 = vadd.f32 %v1616_v5, %v489_v45  ;;  %v238_v58 = vld [vmem:[%s1604_s5 + $0x150] sm:$0xff]  ;;  %v748_v59 = vadd.f32 %v1616_v5, %v490_v48  ;;  %v494_v60 = vmul.f32 %v1611_v1, %v236_v52  ;;  %v749_v62 = vadd.f32 %v1616_v5, %v491_v51 }
  0x47   : > { %984 = vst [vmem:[%s1639_s25 + $0x80] sm:$0xff] %v728_v61  ;;  %v239_v61 = vld [vmem:[%s1604_s5 + $0x158] sm:$0xff]  ;;  %v495_v63 = vmul.f32 %v1611_v1, %v237_v55  ;;  %v750_v2 = vadd.f32 %v1616_v5, %v492_v54  ;;  %v496_v3 = vmul.f32 %v1611_v1, %v238_v58  ;;  %v751_v6 = vadd.f32 %v1616_v5, %v493_v57 }
  0x48   : > { %985 = vst [vmem:[%s1639_s25 + $0x88] sm:$0xff] %v729_v0  ;;  %v240_v0 = vld [vmem:[%s1604_s5 + $0x160] sm:$0xff]  ;;  %v497_v7 = vmul.f32 %v1611_v1, %v239_v61  ;;  %v752_v9 = vadd.f32 %v1616_v5, %v494_v60 }
  0x49   : > { %986 = vst [vmem:[%s1639_s25 + $0x90] sm:$0xff] %v730_v4  ;;  %v241_v4 = vld [vmem:[%s1604_s5 + $0x168] sm:$0xff]  ;;  %v498_v10 = vmul.f32 %v1611_v1, %v240_v0  ;;  %v753_v12 = vadd.f32 %v1616_v5, %v495_v63  ;;  %v754_v15 = vadd.f32 %v1616_v5, %v496_v3 }
  0x4a   : > { %987 = vst [vmem:[%s1639_s25 + $0x98] sm:$0xff] %v731_v8  ;;  %v242_v8 = vld [vmem:[%s1604_s5 + $0x170] sm:$0xff]  ;;  %v499_v13 = vmul.f32 %v1611_v1, %v241_v4  ;;  %v755_v18 = vadd.f32 %v1616_v5, %v497_v7 }
  0x4b   : > { %988 = vst [vmem:[%s1639_s25 + $0xa0] sm:$0xff] %v732_v11  ;;  %v243_v11 = vld [vmem:[%s1604_s5 + $0x178] sm:$0xff]  ;;  %v500_v16 = vmul.f32 %v1611_v1, %v242_v8  ;;  %v756_v21 = vadd.f32 %v1616_v5, %v498_v10 }
  0x4c   : > { %989 = vst [vmem:[%s1639_s25 + $0xa8] sm:$0xff] %v733_v14  ;;  %v244_v14 = vld [vmem:[%s1604_s5 + $0x180] sm:$0xff]  ;;  %v501_v19 = vmul.f32 %v1611_v1, %v243_v11  ;;  %v757_v24 = vadd.f32 %v1616_v5, %v499_v13 }
  0x4d   : > { %990 = vst [vmem:[%s1639_s25 + $0xb0] sm:$0xff] %v734_v17  ;;  %v245_v17 = vld [vmem:[%s1604_s5 + $0x188] sm:$0xff]  ;;  %v502_v22 = vmul.f32 %v1611_v1, %v244_v14  ;;  %v758_v27 = vadd.f32 %v1616_v5, %v500_v16 }
  0x4e   : > { %991 = vst [vmem:[%s1639_s25 + $0xb8] sm:$0xff] %v735_v20  ;;  %v246_v20 = vld [vmem:[%s1604_s5 + $0x190] sm:$0xff]  ;;  %v503_v25 = vmul.f32 %v1611_v1, %v245_v17  ;;  %v759_v30 = vadd.f32 %v1616_v5, %v501_v19 }
  0x4f   : > { %992 = vst [vmem:[%s1639_s25 + $0xc0] sm:$0xff] %v736_v23  ;;  %v247_v23 = vld [vmem:[%s1604_s5 + $0x198] sm:$0xff]  ;;  %v504_v28 = vmul.f32 %v1611_v1, %v246_v20  ;;  %v760_v33 = vadd.f32 %v1616_v5, %v502_v22 }
  0x50   : > { %993 = vst [vmem:[%s1639_s25 + $0xc8] sm:$0xff] %v737_v26  ;;  %v248_v26 = vld [vmem:[%s1604_s5 + $0x1a0] sm:$0xff]  ;;  %v505_v31 = vmul.f32 %v1611_v1, %v247_v23  ;;  %v761_v36 = vadd.f32 %v1616_v5, %v503_v25 }
  0x51   : > { %994 = vst [vmem:[%s1639_s25 + $0xd0] sm:$0xff] %v738_v29  ;;  %v249_v29 = vld [vmem:[%s1604_s5 + $0x1a8] sm:$0xff]  ;;  %v506_v34 = vmul.f32 %v1611_v1, %v248_v26  ;;  %v762_v39 = vadd.f32 %v1616_v5, %v504_v28 }
  0x52   : > { %995 = vst [vmem:[%s1639_s25 + $0xd8] sm:$0xff] %v739_v32  ;;  %v250_v32 = vld [vmem:[%s1604_s5 + $0x1b0] sm:$0xff]  ;;  %v507_v37 = vmul.f32 %v1611_v1, %v249_v29  ;;  %v763_v42 = vadd.f32 %v1616_v5, %v505_v31 }
  0x53   : > { %996 = vst [vmem:[%s1639_s25 + $0xe0] sm:$0xff] %v740_v35  ;;  %v251_v35 = vld [vmem:[%s1604_s5 + $0x1b8] sm:$0xff]  ;;  %v508_v40 = vmul.f32 %v1611_v1, %v250_v32  ;;  %v764_v45 = vadd.f32 %v1616_v5, %v506_v34 }
  0x54   : > { %997 = vst [vmem:[%s1639_s25 + $0xe8] sm:$0xff] %v741_v38  ;;  %v252_v38 = vld [vmem:[%s1604_s5 + $0x1c0] sm:$0xff]  ;;  %v509_v43 = vmul.f32 %v1611_v1, %v251_v35  ;;  %v765_v48 = vadd.f32 %v1616_v5, %v507_v37 }
  0x55   : > { %998 = vst [vmem:[%s1639_s25 + $0xf0] sm:$0xff] %v742_v41  ;;  %v253_v41 = vld [vmem:[%s1604_s5 + $0x1c8] sm:$0xff]  ;;  %v510_v46 = vmul.f32 %v1611_v1, %v252_v38  ;;  %v766_v51 = vadd.f32 %v1616_v5, %v508_v40 }
  0x56   : > { %999 = vst [vmem:[%s1639_s25 + $0xf8] sm:$0xff] %v743_v44  ;;  %v254_v44 = vld [vmem:[%s1604_s5 + $0x1d0] sm:$0xff]  ;;  %v511_v49 = vmul.f32 %v1611_v1, %v253_v41  ;;  %v767_v54 = vadd.f32 %v1616_v5, %v509_v43 }
  0x57   : > { %1000 = vst [vmem:[%s1639_s25 + $0x100] sm:$0xff] %v744_v47  ;;  %v255_v47 = vld [vmem:[%s1604_s5 + $0x1d8] sm:$0xff]  ;;  %v512_v52 = vmul.f32 %v1611_v1, %v254_v44  ;;  %v768_v57 = vadd.f32 %v1616_v5, %v510_v46 }
  0x58   : > { %1001 = vst [vmem:[%s1639_s25 + $0x108] sm:$0xff] %v745_v50  ;;  %v256_v50 = vld [vmem:[%s1604_s5 + $0x1e0] sm:$0xff]  ;;  %v513_v55 = vmul.f32 %v1611_v1, %v255_v47  ;;  %v769_v60 = vadd.f32 %v1616_v5, %v511_v49 }
  0x59   : > { %1002 = vst [vmem:[%s1639_s25 + $0x110] sm:$0xff] %v746_v53  ;;  %v257_v53 = vld [vmem:[%s1604_s5 + $0x1e8] sm:$0xff]  ;;  %v514_v58 = vmul.f32 %v1611_v1, %v256_v50  ;;  %v770_v63 = vadd.f32 %v1616_v5, %v512_v52 }
  0x5a   : > { %1003 = vst [vmem:[%s1639_s25 + $0x118] sm:$0xff] %v747_v56  ;;  %v258_v56 = vld [vmem:[%s1604_s5 + $0x1f0] sm:$0xff]  ;;  %v515_v61 = vmul.f32 %v1611_v1, %v257_v53  ;;  %v771_v3 = vadd.f32 %v1616_v5, %v513_v55 }
  0x5b   : > { %1004 = vst [vmem:[%s1639_s25 + $0x120] sm:$0xff] %v748_v59  ;;  %v259_v59 = vld [vmem:[%s1604_s5 + $0x1f8] sm:$0xff]  ;;  %v516_v0 = vmul.f32 %v1611_v1, %v258_v56  ;;  %v772_v7 = vadd.f32 %v1616_v5, %v514_v58 }
  0x5c   : > { %1005 = vst [vmem:[%s1639_s25 + $0x128] sm:$0xff] %v749_v62  ;;  %v260_v62 = vld [vmem:[%s1604_s5 + $0x200] sm:$0xff]  ;;  %v517_v4 = vmul.f32 %v1611_v1, %v259_v59  ;;  %v773_v10 = vadd.f32 %v1616_v5, %v515_v61 }
  0x5d   : > { %1006 = vst [vmem:[%s1639_s25 + $0x130] sm:$0xff] %v750_v2  ;;  %v261_v2 = vld [vmem:[%s1604_s5 + $0x208] sm:$0xff]  ;;  %v518_v8 = vmul.f32 %v1611_v1, %v260_v62  ;;  %v774_v13 = vadd.f32 %v1616_v5, %v516_v0 }
  0x5e   : > { %1007 = vst [vmem:[%s1639_s25 + $0x138] sm:$0xff] %v751_v6  ;;  %v262_v6 = vld [vmem:[%s1604_s5 + $0x210] sm:$0xff]  ;;  %v519_v11 = vmul.f32 %v1611_v1, %v261_v2  ;;  %v775_v16 = vadd.f32 %v1616_v5, %v517_v4 }
  0x5f   : > { %1008 = vst [vmem:[%s1639_s25 + $0x140] sm:$0xff] %v752_v9  ;;  %v263_v9 = vld [vmem:[%s1604_s5 + $0x218] sm:$0xff]  ;;  %v520_v14 = vmul.f32 %v1611_v1, %v262_v6  ;;  %v776_v19 = vadd.f32 %v1616_v5, %v518_v8 }
  0x60   : > { %1009 = vst [vmem:[%s1639_s25 + $0x148] sm:$0xff] %v753_v12  ;;  %v264_v12 = vld [vmem:[%s1604_s5 + $0x220] sm:$0xff]  ;;  %v521_v17 = vmul.f32 %v1611_v1, %v263_v9  ;;  %v777_v22 = vadd.f32 %v1616_v5, %v519_v11 }
  0x61   : > { %1010 = vst [vmem:[%s1639_s25 + $0x150] sm:$0xff] %v754_v15  ;;  %v265_v15 = vld [vmem:[%s1604_s5 + $0x228] sm:$0xff]  ;;  %v522_v20 = vmul.f32 %v1611_v1, %v264_v12  ;;  %v778_v25 = vadd.f32 %v1616_v5, %v520_v14 }
  0x62   : > { %1011 = vst [vmem:[%s1639_s25 + $0x158] sm:$0xff] %v755_v18  ;;  %v266_v18 = vld [vmem:[%s1604_s5 + $0x230] sm:$0xff]  ;;  %v523_v23 = vmul.f32 %v1611_v1, %v265_v15  ;;  %v779_v28 = vadd.f32 %v1616_v5, %v521_v17 }
  0x63   : > { %1012 = vst [vmem:[%s1639_s25 + $0x160] sm:$0xff] %v756_v21  ;;  %v267_v21 = vld [vmem:[%s1604_s5 + $0x238] sm:$0xff]  ;;  %v524_v26 = vmul.f32 %v1611_v1, %v266_v18  ;;  %v780_v31 = vadd.f32 %v1616_v5, %v522_v20 }
  0x64   : > { %1013 = vst [vmem:[%s1639_s25 + $0x168] sm:$0xff] %v757_v24  ;;  %v268_v24 = vld [vmem:[%s1604_s5 + $0x240] sm:$0xff]  ;;  %v525_v29 = vmul.f32 %v1611_v1, %v267_v21  ;;  %v781_v34 = vadd.f32 %v1616_v5, %v523_v23 }
  0x65   : > { %1014 = vst [vmem:[%s1639_s25 + $0x170] sm:$0xff] %v758_v27  ;;  %v269_v27 = vld [vmem:[%s1604_s5 + $0x248] sm:$0xff]  ;;  %v526_v32 = vmul.f32 %v1611_v1, %v268_v24  ;;  %v782_v37 = vadd.f32 %v1616_v5, %v524_v26 }
  0x66   : > { %1015 = vst [vmem:[%s1639_s25 + $0x178] sm:$0xff] %v759_v30  ;;  %v270_v30 = vld [vmem:[%s1604_s5 + $0x250] sm:$0xff]  ;;  %v527_v35 = vmul.f32 %v1611_v1, %v269_v27  ;;  %v783_v40 = vadd.f32 %v1616_v5, %v525_v29 }
  0x67   : > { %1016 = vst [vmem:[%s1639_s25 + $0x180] sm:$0xff] %v760_v33  ;;  %v271_v33 = vld [vmem:[%s1604_s5 + $0x258] sm:$0xff]  ;;  %v528_v38 = vmul.f32 %v1611_v1, %v270_v30  ;;  %v784_v43 = vadd.f32 %v1616_v5, %v526_v32 }
  0x68   : > { %1017 = vst [vmem:[%s1639_s25 + $0x188] sm:$0xff] %v761_v36  ;;  %v272_v36 = vld [vmem:[%s1604_s5 + $0x260] sm:$0xff]  ;;  %v529_v41 = vmul.f32 %v1611_v1, %v271_v33  ;;  %v785_v46 = vadd.f32 %v1616_v5, %v527_v35 }
  0x69   : > { %1018 = vst [vmem:[%s1639_s25 + $0x190] sm:$0xff] %v762_v39  ;;  %v273_v39 = vld [vmem:[%s1604_s5 + $0x268] sm:$0xff]  ;;  %v530_v44 = vmul.f32 %v1611_v1, %v272_v36  ;;  %v786_v49 = vadd.f32 %v1616_v5, %v528_v38 }
  0x6a   : > { %1019 = vst [vmem:[%s1639_s25 + $0x198] sm:$0xff] %v763_v42  ;;  %v274_v42 = vld [vmem:[%s1604_s5 + $0x270] sm:$0xff]  ;;  %v531_v47 = vmul.f32 %v1611_v1, %v273_v39  ;;  %v787_v52 = vadd.f32 %v1616_v5, %v529_v41 }
  0x6b   : > { %1020 = vst [vmem:[%s1639_s25 + $0x1a0] sm:$0xff] %v764_v45  ;;  %v275_v45 = vld [vmem:[%s1604_s5 + $0x278] sm:$0xff]  ;;  %v532_v50 = vmul.f32 %v1611_v1, %v274_v42  ;;  %v788_v55 = vadd.f32 %v1616_v5, %v530_v44 }
  0x6c   : > { %1021 = vst [vmem:[%s1639_s25 + $0x1a8] sm:$0xff] %v765_v48  ;;  %v276_v48 = vld [vmem:[%s1604_s5 + $0x280] sm:$0xff]  ;;  %v533_v53 = vmul.f32 %v1611_v1, %v275_v45  ;;  %v789_v58 = vadd.f32 %v1616_v5, %v531_v47 }
  0x6d   : > { %1022 = vst [vmem:[%s1639_s25 + $0x1b0] sm:$0xff] %v766_v51  ;;  %v277_v51 = vld [vmem:[%s1604_s5 + $0x288] sm:$0xff]  ;;  %v534_v56 = vmul.f32 %v1611_v1, %v276_v48  ;;  %v790_v61 = vadd.f32 %v1616_v5, %v532_v50 }
  0x6e   : > { %1023 = vst [vmem:[%s1639_s25 + $0x1b8] sm:$0xff] %v767_v54  ;;  %v278_v54 = vld [vmem:[%s1604_s5 + $0x290] sm:$0xff]  ;;  %v535_v59 = vmul.f32 %v1611_v1, %v277_v51  ;;  %v791_v0 = vadd.f32 %v1616_v5, %v533_v53 }
  0x6f   : > { %1024 = vst [vmem:[%s1639_s25 + $0x1c0] sm:$0xff] %v768_v57  ;;  %v279_v57 = vld [vmem:[%s1604_s5 + $0x298] sm:$0xff]  ;;  %v536_v62 = vmul.f32 %v1611_v1, %v278_v54  ;;  %v792_v4 = vadd.f32 %v1616_v5, %v534_v56 }
  0x70   : > { %1025 = vst [vmem:[%s1639_s25 + $0x1c8] sm:$0xff] %v769_v60  ;;  %v280_v60 = vld [vmem:[%s1604_s5 + $0x2a0] sm:$0xff]  ;;  %v537_v2 = vmul.f32 %v1611_v1, %v279_v57  ;;  %v793_v8 = vadd.f32 %v1616_v5, %v535_v59 }
  0x71   : > { %1026 = vst [vmem:[%s1639_s25 + $0x1d0] sm:$0xff] %v770_v63  ;;  %v281_v63 = vld [vmem:[%s1604_s5 + $0x2a8] sm:$0xff]  ;;  %v538_v6 = vmul.f32 %v1611_v1, %v280_v60  ;;  %v794_v11 = vadd.f32 %v1616_v5, %v536_v62 }
  0x72   : > { %1027 = vst [vmem:[%s1639_s25 + $0x1d8] sm:$0xff] %v771_v3  ;;  %v282_v3 = vld [vmem:[%s1604_s5 + $0x2b0] sm:$0xff]  ;;  %v539_v9 = vmul.f32 %v1611_v1, %v281_v63  ;;  %v795_v14 = vadd.f32 %v1616_v5, %v537_v2 }
  0x73   : > { %1028 = vst [vmem:[%s1639_s25 + $0x1e0] sm:$0xff] %v772_v7  ;;  %v283_v7 = vld [vmem:[%s1604_s5 + $0x2b8] sm:$0xff]  ;;  %v540_v12 = vmul.f32 %v1611_v1, %v282_v3  ;;  %v796_v17 = vadd.f32 %v1616_v5, %v538_v6 }
  0x74   : > { %1029 = vst [vmem:[%s1639_s25 + $0x1e8] sm:$0xff] %v773_v10  ;;  %v284_v10 = vld [vmem:[%s1604_s5 + $0x2c0] sm:$0xff]  ;;  %v541_v15 = vmul.f32 %v1611_v1, %v283_v7  ;;  %v797_v20 = vadd.f32 %v1616_v5, %v539_v9 }
  0x75   : > { %1030 = vst [vmem:[%s1639_s25 + $0x1f0] sm:$0xff] %v774_v13  ;;  %v285_v13 = vld [vmem:[%s1604_s5 + $0x2c8] sm:$0xff]  ;;  %v542_v18 = vmul.f32 %v1611_v1, %v284_v10  ;;  %v798_v23 = vadd.f32 %v1616_v5, %v540_v12 }
  0x76   : > { %1031 = vst [vmem:[%s1639_s25 + $0x1f8] sm:$0xff] %v775_v16  ;;  %v286_v16 = vld [vmem:[%s1604_s5 + $0x2d0] sm:$0xff]  ;;  %v543_v21 = vmul.f32 %v1611_v1, %v285_v13  ;;  %v799_v26 = vadd.f32 %v1616_v5, %v541_v15 }
  0x77   : > { %1032 = vst [vmem:[%s1639_s25 + $0x200] sm:$0xff] %v776_v19  ;;  %v287_v19 = vld [vmem:[%s1604_s5 + $0x2d8] sm:$0xff]  ;;  %v544_v24 = vmul.f32 %v1611_v1, %v286_v16  ;;  %v800_v29 = vadd.f32 %v1616_v5, %v542_v18 }
  0x78   : > { %1033 = vst [vmem:[%s1639_s25 + $0x208] sm:$0xff] %v777_v22  ;;  %v288_v22 = vld [vmem:[%s1604_s5 + $0x2e0] sm:$0xff]  ;;  %v545_v27 = vmul.f32 %v1611_v1, %v287_v19  ;;  %v801_v32 = vadd.f32 %v1616_v5, %v543_v21 }
  0x79   : > { %1034 = vst [vmem:[%s1639_s25 + $0x210] sm:$0xff] %v778_v25  ;;  %v289_v25 = vld [vmem:[%s1604_s5 + $0x2e8] sm:$0xff]  ;;  %v546_v30 = vmul.f32 %v1611_v1, %v288_v22  ;;  %v802_v35 = vadd.f32 %v1616_v5, %v544_v24 }
  0x7a   : > { %1035 = vst [vmem:[%s1639_s25 + $0x218] sm:$0xff] %v779_v28  ;;  %v290_v28 = vld [vmem:[%s1604_s5 + $0x2f0] sm:$0xff]  ;;  %v547_v33 = vmul.f32 %v1611_v1, %v289_v25  ;;  %v803_v38 = vadd.f32 %v1616_v5, %v545_v27 }
  0x7b   : > { %1036 = vst [vmem:[%s1639_s25 + $0x220] sm:$0xff] %v780_v31  ;;  %v291_v31 = vld [vmem:[%s1604_s5 + $0x2f8] sm:$0xff]  ;;  %v548_v36 = vmul.f32 %v1611_v1, %v290_v28  ;;  %v804_v41 = vadd.f32 %v1616_v5, %v546_v30 }
  0x7c   : > { %1037 = vst [vmem:[%s1639_s25 + $0x228] sm:$0xff] %v781_v34  ;;  %v292_v34 = vld [vmem:[%s1604_s5 + $0x300] sm:$0xff]  ;;  %v549_v39 = vmul.f32 %v1611_v1, %v291_v31  ;;  %v805_v44 = vadd.f32 %v1616_v5, %v547_v33 }
  0x7d   : > { %1038 = vst [vmem:[%s1639_s25 + $0x230] sm:$0xff] %v782_v37  ;;  %v293_v37 = vld [vmem:[%s1604_s5 + $0x308] sm:$0xff]  ;;  %v550_v42 = vmul.f32 %v1611_v1, %v292_v34  ;;  %v806_v47 = vadd.f32 %v1616_v5, %v548_v36 }
  0x7e   : > { %1039 = vst [vmem:[%s1639_s25 + $0x238] sm:$0xff] %v783_v40  ;;  %v294_v40 = vld [vmem:[%s1604_s5 + $0x310] sm:$0xff]  ;;  %v551_v45 = vmul.f32 %v1611_v1, %v293_v37  ;;  %v807_v50 = vadd.f32 %v1616_v5, %v549_v39 }
  0x7f   : > { %1040 = vst [vmem:[%s1639_s25 + $0x240] sm:$0xff] %v784_v43  ;;  %v295_v43 = vld [vmem:[%s1604_s5 + $0x318] sm:$0xff]  ;;  %v552_v48 = vmul.f32 %v1611_v1, %v294_v40  ;;  %v808_v53 = vadd.f32 %v1616_v5, %v550_v42 }
  0x80   : > { %1041 = vst [vmem:[%s1639_s25 + $0x248] sm:$0xff] %v785_v46  ;;  %v296_v46 = vld [vmem:[%s1604_s5 + $0x320] sm:$0xff]  ;;  %v553_v51 = vmul.f32 %v1611_v1, %v295_v43  ;;  %v809_v56 = vadd.f32 %v1616_v5, %v551_v45 }
  0x81   : > { %1042 = vst [vmem:[%s1639_s25 + $0x250] sm:$0xff] %v786_v49  ;;  %v297_v49 = vld [vmem:[%s1604_s5 + $0x328] sm:$0xff]  ;;  %v554_v54 = vmul.f32 %v1611_v1, %v296_v46  ;;  %v810_v59 = vadd.f32 %v1616_v5, %v552_v48 }
  0x82   : > { %1043 = vst [vmem:[%s1639_s25 + $0x258] sm:$0xff] %v787_v52  ;;  %v298_v52 = vld [vmem:[%s1604_s5 + $0x330] sm:$0xff]  ;;  %v555_v57 = vmul.f32 %v1611_v1, %v297_v49  ;;  %v811_v62 = vadd.f32 %v1616_v5, %v553_v51 }
  0x83   : > { %1044 = vst [vmem:[%s1639_s25 + $0x260] sm:$0xff] %v788_v55  ;;  %v299_v55 = vld [vmem:[%s1604_s5 + $0x338] sm:$0xff]  ;;  %v556_v60 = vmul.f32 %v1611_v1, %v298_v52  ;;  %v812_v2 = vadd.f32 %v1616_v5, %v554_v54 }
  0x84   : > { %1045 = vst [vmem:[%s1639_s25 + $0x268] sm:$0xff] %v789_v58  ;;  %v300_v58 = vld [vmem:[%s1604_s5 + $0x340] sm:$0xff]  ;;  %v557_v63 = vmul.f32 %v1611_v1, %v299_v55  ;;  %v813_v6 = vadd.f32 %v1616_v5, %v555_v57 }
  0x85   : > { %1046 = vst [vmem:[%s1639_s25 + $0x270] sm:$0xff] %v790_v61  ;;  %v301_v61 = vld [vmem:[%s1604_s5 + $0x348] sm:$0xff]  ;;  %v558_v3 = vmul.f32 %v1611_v1, %v300_v58  ;;  %v814_v9 = vadd.f32 %v1616_v5, %v556_v60 }
  0x86   : > { %1047 = vst [vmem:[%s1639_s25 + $0x278] sm:$0xff] %v791_v0  ;;  %v302_v0 = vld [vmem:[%s1604_s5 + $0x350] sm:$0xff]  ;;  %v559_v7 = vmul.f32 %v1611_v1, %v301_v61  ;;  %v815_v12 = vadd.f32 %v1616_v5, %v557_v63 }
  0x87   : > { %1048 = vst [vmem:[%s1639_s25 + $0x280] sm:$0xff] %v792_v4  ;;  %v303_v4 = vld [vmem:[%s1604_s5 + $0x358] sm:$0xff]  ;;  %v560_v10 = vmul.f32 %v1611_v1, %v302_v0  ;;  %v816_v15 = vadd.f32 %v1616_v5, %v558_v3 }
  0x88   : > { %1049 = vst [vmem:[%s1639_s25 + $0x288] sm:$0xff] %v793_v8  ;;  %v304_v8 = vld [vmem:[%s1604_s5 + $0x360] sm:$0xff]  ;;  %v561_v13 = vmul.f32 %v1611_v1, %v303_v4  ;;  %v817_v18 = vadd.f32 %v1616_v5, %v559_v7 }
  0x89   : > { %1050 = vst [vmem:[%s1639_s25 + $0x290] sm:$0xff] %v794_v11  ;;  %v305_v11 = vld [vmem:[%s1604_s5 + $0x368] sm:$0xff]  ;;  %v562_v16 = vmul.f32 %v1611_v1, %v304_v8  ;;  %v818_v21 = vadd.f32 %v1616_v5, %v560_v10 }
  0x8a   : > { %1051 = vst [vmem:[%s1639_s25 + $0x298] sm:$0xff] %v795_v14  ;;  %v306_v14 = vld [vmem:[%s1604_s5 + $0x370] sm:$0xff]  ;;  %v563_v19 = vmul.f32 %v1611_v1, %v305_v11  ;;  %v819_v24 = vadd.f32 %v1616_v5, %v561_v13 }
  0x8b   : > { %1052 = vst [vmem:[%s1639_s25 + $0x2a0] sm:$0xff] %v796_v17  ;;  %v307_v17 = vld [vmem:[%s1604_s5 + $0x378] sm:$0xff]  ;;  %v564_v22 = vmul.f32 %v1611_v1, %v306_v14  ;;  %v820_v27 = vadd.f32 %v1616_v5, %v562_v16 }
  0x8c   : > { %1053 = vst [vmem:[%s1639_s25 + $0x2a8] sm:$0xff] %v797_v20  ;;  %v308_v20 = vld [vmem:[%s1604_s5 + $0x380] sm:$0xff]  ;;  %v565_v25 = vmul.f32 %v1611_v1, %v307_v17  ;;  %v821_v30 = vadd.f32 %v1616_v5, %v563_v19 }
  0x8d   : > { %1054 = vst [vmem:[%s1639_s25 + $0x2b0] sm:$0xff] %v798_v23  ;;  %v309_v23 = vld [vmem:[%s1604_s5 + $0x388] sm:$0xff]  ;;  %v566_v28 = vmul.f32 %v1611_v1, %v308_v20  ;;  %v822_v33 = vadd.f32 %v1616_v5, %v564_v22 }
  0x8e   : > { %1055 = vst [vmem:[%s1639_s25 + $0x2b8] sm:$0xff] %v799_v26  ;;  %v310_v26 = vld [vmem:[%s1604_s5 + $0x390] sm:$0xff]  ;;  %v567_v31 = vmul.f32 %v1611_v1, %v309_v23  ;;  %v823_v36 = vadd.f32 %v1616_v5, %v565_v25 }
  0x8f   : > { %1056 = vst [vmem:[%s1639_s25 + $0x2c0] sm:$0xff] %v800_v29  ;;  %v311_v29 = vld [vmem:[%s1604_s5 + $0x398] sm:$0xff]  ;;  %v568_v34 = vmul.f32 %v1611_v1, %v310_v26  ;;  %v824_v39 = vadd.f32 %v1616_v5, %v566_v28 }
  0x90   : > { %1057 = vst [vmem:[%s1639_s25 + $0x2c8] sm:$0xff] %v801_v32  ;;  %v312_v32 = vld [vmem:[%s1604_s5 + $0x3a0] sm:$0xff]  ;;  %v569_v37 = vmul.f32 %v1611_v1, %v311_v29  ;;  %v825_v42 = vadd.f32 %v1616_v5, %v567_v31 }
  0x91   : > { %1058 = vst [vmem:[%s1639_s25 + $0x2d0] sm:$0xff] %v802_v35  ;;  %v313_v35 = vld [vmem:[%s1604_s5 + $0x3a8] sm:$0xff]  ;;  %v570_v40 = vmul.f32 %v1611_v1, %v312_v32  ;;  %v826_v45 = vadd.f32 %v1616_v5, %v568_v34 }
  0x92   : > { %1059 = vst [vmem:[%s1639_s25 + $0x2d8] sm:$0xff] %v803_v38  ;;  %v314_v38 = vld [vmem:[%s1604_s5 + $0x3b0] sm:$0xff]  ;;  %v571_v43 = vmul.f32 %v1611_v1, %v313_v35  ;;  %v827_v48 = vadd.f32 %v1616_v5, %v569_v37 }
  0x93   : > { %1060 = vst [vmem:[%s1639_s25 + $0x2e0] sm:$0xff] %v804_v41  ;;  %v315_v41 = vld [vmem:[%s1604_s5 + $0x3b8] sm:$0xff]  ;;  %v572_v46 = vmul.f32 %v1611_v1, %v314_v38  ;;  %v828_v51 = vadd.f32 %v1616_v5, %v570_v40 }
  0x94   : > { %1061 = vst [vmem:[%s1639_s25 + $0x2e8] sm:$0xff] %v805_v44  ;;  %v316_v44 = vld [vmem:[%s1604_s5 + $0x3c0] sm:$0xff]  ;;  %v573_v49 = vmul.f32 %v1611_v1, %v315_v41  ;;  %v829_v54 = vadd.f32 %v1616_v5, %v571_v43 }
  0x95   : > { %1062 = vst [vmem:[%s1639_s25 + $0x2f0] sm:$0xff] %v806_v47  ;;  %v317_v47 = vld [vmem:[%s1604_s5 + $0x3c8] sm:$0xff]  ;;  %v574_v52 = vmul.f32 %v1611_v1, %v316_v44  ;;  %v830_v57 = vadd.f32 %v1616_v5, %v572_v46 }
  0x96   : > { %1063 = vst [vmem:[%s1639_s25 + $0x2f8] sm:$0xff] %v807_v50  ;;  %v318_v50 = vld [vmem:[%s1604_s5 + $0x3d0] sm:$0xff]  ;;  %v575_v55 = vmul.f32 %v1611_v1, %v317_v47  ;;  %v831_v60 = vadd.f32 %v1616_v5, %v573_v49 }
  0x97   : > { %1064 = vst [vmem:[%s1639_s25 + $0x300] sm:$0xff] %v808_v53  ;;  %v319_v53 = vld [vmem:[%s1604_s5 + $0x3d8] sm:$0xff]  ;;  %v576_v58 = vmul.f32 %v1611_v1, %v318_v50  ;;  %v832_v63 = vadd.f32 %v1616_v5, %v574_v52 }
  0x98   : > { %1065 = vst [vmem:[%s1639_s25 + $0x308] sm:$0xff] %v809_v56  ;;  %v320_v56 = vld [vmem:[%s1604_s5 + $0x3e0] sm:$0xff]  ;;  %v577_v61 = vmul.f32 %v1611_v1, %v319_v53  ;;  %v833_v3 = vadd.f32 %v1616_v5, %v575_v55 }
  0x99   : > { %1066 = vst [vmem:[%s1639_s25 + $0x310] sm:$0xff] %v810_v59  ;;  %v321_v59 = vld [vmem:[%s1604_s5 + $0x3e8] sm:$0xff]  ;;  %v578_v0 = vmul.f32 %v1611_v1, %v320_v56  ;;  %v834_v7 = vadd.f32 %v1616_v5, %v576_v58 }
  0x9a   : > { %1067 = vst [vmem:[%s1639_s25 + $0x318] sm:$0xff] %v811_v62  ;;  %v322_v62 = vld [vmem:[%s1604_s5 + $0x3f0] sm:$0xff]  ;;  %v579_v4 = vmul.f32 %v1611_v1, %v321_v59  ;;  %v835_v10 = vadd.f32 %v1616_v5, %v577_v61 }
  0x9b   : > { %1068 = vst [vmem:[%s1639_s25 + $0x320] sm:$0xff] %v812_v2  ;;  %v323_v2 = vld [vmem:[%s1604_s5 + $0x3f8] sm:$0xff]  ;;  %v580_v8 = vmul.f32 %v1611_v1, %v322_v62  ;;  %v836_v13 = vadd.f32 %v1616_v5, %v578_v0 }
  0x9c   : > { %1069 = vst [vmem:[%s1639_s25 + $0x328] sm:$0xff] %v813_v6  ;;  %v324_v6 = vld [vmem:[%s1604_s5 + $0x400] sm:$0xff]  ;;  %v581_v11 = vmul.f32 %v1611_v1, %v323_v2  ;;  %v837_v16 = vadd.f32 %v1616_v5, %v579_v4 }
  0x9d   : > { %1070 = vst [vmem:[%s1639_s25 + $0x330] sm:$0xff] %v814_v9  ;;  %v325_v9 = vld [vmem:[%s1604_s5 + $0x408] sm:$0xff]  ;;  %v582_v14 = vmul.f32 %v1611_v1, %v324_v6  ;;  %v838_v19 = vadd.f32 %v1616_v5, %v580_v8 }
  0x9e   : > { %1071 = vst [vmem:[%s1639_s25 + $0x338] sm:$0xff] %v815_v12  ;;  %v326_v12 = vld [vmem:[%s1604_s5 + $0x410] sm:$0xff]  ;;  %v583_v17 = vmul.f32 %v1611_v1, %v325_v9  ;;  %v839_v22 = vadd.f32 %v1616_v5, %v581_v11 }
  0x9f   : > { %1072 = vst [vmem:[%s1639_s25 + $0x340] sm:$0xff] %v816_v15  ;;  %v327_v15 = vld [vmem:[%s1604_s5 + $0x418] sm:$0xff]  ;;  %v584_v20 = vmul.f32 %v1611_v1, %v326_v12  ;;  %v840_v25 = vadd.f32 %v1616_v5, %v582_v14 }
  0xa0   : > { %1073 = vst [vmem:[%s1639_s25 + $0x348] sm:$0xff] %v817_v18  ;;  %v328_v18 = vld [vmem:[%s1604_s5 + $0x420] sm:$0xff]  ;;  %v585_v23 = vmul.f32 %v1611_v1, %v327_v15  ;;  %v841_v28 = vadd.f32 %v1616_v5, %v583_v17 }
  0xa1   : > { %1074 = vst [vmem:[%s1639_s25 + $0x350] sm:$0xff] %v818_v21  ;;  %v329_v21 = vld [vmem:[%s1604_s5 + $0x428] sm:$0xff]  ;;  %v586_v26 = vmul.f32 %v1611_v1, %v328_v18  ;;  %v842_v31 = vadd.f32 %v1616_v5, %v584_v20 }
  0xa2   : > { %1075 = vst [vmem:[%s1639_s25 + $0x358] sm:$0xff] %v819_v24  ;;  %v330_v24 = vld [vmem:[%s1604_s5 + $0x430] sm:$0xff]  ;;  %v587_v29 = vmul.f32 %v1611_v1, %v329_v21  ;;  %v843_v34 = vadd.f32 %v1616_v5, %v585_v23 }
  0xa3   : > { %1076 = vst [vmem:[%s1639_s25 + $0x360] sm:$0xff] %v820_v27  ;;  %v331_v27 = vld [vmem:[%s1604_s5 + $0x438] sm:$0xff]  ;;  %v588_v32 = vmul.f32 %v1611_v1, %v330_v24  ;;  %v844_v37 = vadd.f32 %v1616_v5, %v586_v26 }
  0xa4   : > { %1077 = vst [vmem:[%s1639_s25 + $0x368] sm:$0xff] %v821_v30  ;;  %v332_v30 = vld [vmem:[%s1604_s5 + $0x440] sm:$0xff]  ;;  %v589_v35 = vmul.f32 %v1611_v1, %v331_v27  ;;  %v845_v40 = vadd.f32 %v1616_v5, %v587_v29 }
  0xa5   : > { %1078 = vst [vmem:[%s1639_s25 + $0x370] sm:$0xff] %v822_v33  ;;  %v333_v33 = vld [vmem:[%s1604_s5 + $0x448] sm:$0xff]  ;;  %v590_v38 = vmul.f32 %v1611_v1, %v332_v30  ;;  %v846_v43 = vadd.f32 %v1616_v5, %v588_v32 }
  0xa6   : > { %1079 = vst [vmem:[%s1639_s25 + $0x378] sm:$0xff] %v823_v36  ;;  %v334_v36 = vld [vmem:[%s1604_s5 + $0x450] sm:$0xff]  ;;  %v591_v41 = vmul.f32 %v1611_v1, %v333_v33  ;;  %v847_v46 = vadd.f32 %v1616_v5, %v589_v35 }
  0xa7   : > { %1080 = vst [vmem:[%s1639_s25 + $0x380] sm:$0xff] %v824_v39  ;;  %v335_v39 = vld [vmem:[%s1604_s5 + $0x458] sm:$0xff]  ;;  %v592_v44 = vmul.f32 %v1611_v1, %v334_v36  ;;  %v848_v49 = vadd.f32 %v1616_v5, %v590_v38 }
  0xa8   : > { %1081 = vst [vmem:[%s1639_s25 + $0x388] sm:$0xff] %v825_v42  ;;  %v336_v42 = vld [vmem:[%s1604_s5 + $0x460] sm:$0xff]  ;;  %v593_v47 = vmul.f32 %v1611_v1, %v335_v39  ;;  %v849_v52 = vadd.f32 %v1616_v5, %v591_v41 }
  0xa9   : > { %1082 = vst [vmem:[%s1639_s25 + $0x390] sm:$0xff] %v826_v45  ;;  %v337_v45 = vld [vmem:[%s1604_s5 + $0x468] sm:$0xff]  ;;  %v594_v50 = vmul.f32 %v1611_v1, %v336_v42  ;;  %v850_v55 = vadd.f32 %v1616_v5, %v592_v44 }
  0xaa   : > { %1083 = vst [vmem:[%s1639_s25 + $0x398] sm:$0xff] %v827_v48  ;;  %v338_v48 = vld [vmem:[%s1604_s5 + $0x470] sm:$0xff]  ;;  %v595_v53 = vmul.f32 %v1611_v1, %v337_v45  ;;  %v851_v58 = vadd.f32 %v1616_v5, %v593_v47 }
  0xab   : > { %1084 = vst [vmem:[%s1639_s25 + $0x3a0] sm:$0xff] %v828_v51  ;;  %v339_v51 = vld [vmem:[%s1604_s5 + $0x478] sm:$0xff]  ;;  %v596_v56 = vmul.f32 %v1611_v1, %v338_v48  ;;  %v852_v61 = vadd.f32 %v1616_v5, %v594_v50 }
  0xac   : > { %1085 = vst [vmem:[%s1639_s25 + $0x3a8] sm:$0xff] %v829_v54  ;;  %v340_v54 = vld [vmem:[%s1604_s5 + $0x480] sm:$0xff]  ;;  %v597_v59 = vmul.f32 %v1611_v1, %v339_v51  ;;  %v853_v0 = vadd.f32 %v1616_v5, %v595_v53 }
  0xad   : > { %1086 = vst [vmem:[%s1639_s25 + $0x3b0] sm:$0xff] %v830_v57  ;;  %v341_v57 = vld [vmem:[%s1604_s5 + $0x488] sm:$0xff]  ;;  %v598_v62 = vmul.f32 %v1611_v1, %v340_v54  ;;  %v854_v4 = vadd.f32 %v1616_v5, %v596_v56 }
  0xae   : > { %1087 = vst [vmem:[%s1639_s25 + $0x3b8] sm:$0xff] %v831_v60  ;;  %v342_v60 = vld [vmem:[%s1604_s5 + $0x490] sm:$0xff]  ;;  %v599_v2 = vmul.f32 %v1611_v1, %v341_v57  ;;  %v855_v8 = vadd.f32 %v1616_v5, %v597_v59 }
  0xaf   : > { %1088 = vst [vmem:[%s1639_s25 + $0x3c0] sm:$0xff] %v832_v63  ;;  %v343_v63 = vld [vmem:[%s1604_s5 + $0x498] sm:$0xff]  ;;  %v600_v6 = vmul.f32 %v1611_v1, %v342_v60  ;;  %v856_v11 = vadd.f32 %v1616_v5, %v598_v62 }
  0xb0   : > { %1089 = vst [vmem:[%s1639_s25 + $0x3c8] sm:$0xff] %v833_v3  ;;  %v344_v3 = vld [vmem:[%s1604_s5 + $0x4a0] sm:$0xff]  ;;  %v601_v9 = vmul.f32 %v1611_v1, %v343_v63  ;;  %v857_v14 = vadd.f32 %v1616_v5, %v599_v2 }
  0xb1   : > { %1090 = vst [vmem:[%s1639_s25 + $0x3d0] sm:$0xff] %v834_v7  ;;  %v345_v7 = vld [vmem:[%s1604_s5 + $0x4a8] sm:$0xff]  ;;  %v602_v12 = vmul.f32 %v1611_v1, %v344_v3  ;;  %v858_v17 = vadd.f32 %v1616_v5, %v600_v6 }
  0xb2   : > { %1091 = vst [vmem:[%s1639_s25 + $0x3d8] sm:$0xff] %v835_v10  ;;  %v346_v10 = vld [vmem:[%s1604_s5 + $0x4b0] sm:$0xff]  ;;  %v603_v15 = vmul.f32 %v1611_v1, %v345_v7  ;;  %v859_v20 = vadd.f32 %v1616_v5, %v601_v9 }
  0xb3   : > { %1092 = vst [vmem:[%s1639_s25 + $0x3e0] sm:$0xff] %v836_v13  ;;  %v347_v13 = vld [vmem:[%s1604_s5 + $0x4b8] sm:$0xff]  ;;  %v604_v18 = vmul.f32 %v1611_v1, %v346_v10  ;;  %v860_v23 = vadd.f32 %v1616_v5, %v602_v12 }
  0xb4   : > { %1093 = vst [vmem:[%s1639_s25 + $0x3e8] sm:$0xff] %v837_v16  ;;  %v348_v16 = vld [vmem:[%s1604_s5 + $0x4c0] sm:$0xff]  ;;  %v605_v21 = vmul.f32 %v1611_v1, %v347_v13  ;;  %v861_v26 = vadd.f32 %v1616_v5, %v603_v15 }
  0xb5   : > { %1094 = vst [vmem:[%s1639_s25 + $0x3f0] sm:$0xff] %v838_v19  ;;  %v349_v19 = vld [vmem:[%s1604_s5 + $0x4c8] sm:$0xff]  ;;  %v606_v24 = vmul.f32 %v1611_v1, %v348_v16  ;;  %v862_v29 = vadd.f32 %v1616_v5, %v604_v18 }
  0xb6   : > { %1095 = vst [vmem:[%s1639_s25 + $0x3f8] sm:$0xff] %v839_v22  ;;  %v350_v22 = vld [vmem:[%s1604_s5 + $0x4d0] sm:$0xff]  ;;  %v607_v27 = vmul.f32 %v1611_v1, %v349_v19  ;;  %v863_v32 = vadd.f32 %v1616_v5, %v605_v21 }
  0xb7   : > { %1096 = vst [vmem:[%s1639_s25 + $0x400] sm:$0xff] %v840_v25  ;;  %v351_v25 = vld [vmem:[%s1604_s5 + $0x4d8] sm:$0xff]  ;;  %v608_v30 = vmul.f32 %v1611_v1, %v350_v22  ;;  %v864_v35 = vadd.f32 %v1616_v5, %v606_v24 }
  0xb8   : > { %1097 = vst [vmem:[%s1639_s25 + $0x408] sm:$0xff] %v841_v28  ;;  %v352_v28 = vld [vmem:[%s1604_s5 + $0x4e0] sm:$0xff]  ;;  %v609_v33 = vmul.f32 %v1611_v1, %v351_v25  ;;  %v865_v38 = vadd.f32 %v1616_v5, %v607_v27 }
  0xb9   : > { %1098 = vst [vmem:[%s1639_s25 + $0x410] sm:$0xff] %v842_v31  ;;  %v353_v31 = vld [vmem:[%s1604_s5 + $0x4e8] sm:$0xff]  ;;  %v610_v36 = vmul.f32 %v1611_v1, %v352_v28  ;;  %v866_v41 = vadd.f32 %v1616_v5, %v608_v30 }
  0xba   : > { %1099 = vst [vmem:[%s1639_s25 + $0x418] sm:$0xff] %v843_v34  ;;  %v354_v34 = vld [vmem:[%s1604_s5 + $0x4f0] sm:$0xff]  ;;  %v611_v39 = vmul.f32 %v1611_v1, %v353_v31  ;;  %v867_v44 = vadd.f32 %v1616_v5, %v609_v33 }
  0xbb   : > { %1100 = vst [vmem:[%s1639_s25 + $0x420] sm:$0xff] %v844_v37  ;;  %v355_v37 = vld [vmem:[%s1604_s5 + $0x4f8] sm:$0xff]  ;;  %v612_v42 = vmul.f32 %v1611_v1, %v354_v34  ;;  %v868_v47 = vadd.f32 %v1616_v5, %v610_v36 }
  0xbc   : > { %1101 = vst [vmem:[%s1639_s25 + $0x428] sm:$0xff] %v845_v40  ;;  %v356_v40 = vld [vmem:[%s1604_s5 + $0x500] sm:$0xff]  ;;  %v613_v45 = vmul.f32 %v1611_v1, %v355_v37  ;;  %v869_v50 = vadd.f32 %v1616_v5, %v611_v39 }
  0xbd   : > { %1102 = vst [vmem:[%s1639_s25 + $0x430] sm:$0xff] %v846_v43  ;;  %v357_v43 = vld [vmem:[%s1604_s5 + $0x508] sm:$0xff]  ;;  %v614_v48 = vmul.f32 %v1611_v1, %v356_v40  ;;  %v870_v53 = vadd.f32 %v1616_v5, %v612_v42 }
  0xbe   : > { %1103 = vst [vmem:[%s1639_s25 + $0x438] sm:$0xff] %v847_v46  ;;  %v358_v46 = vld [vmem:[%s1604_s5 + $0x510] sm:$0xff]  ;;  %v615_v51 = vmul.f32 %v1611_v1, %v357_v43  ;;  %v871_v56 = vadd.f32 %v1616_v5, %v613_v45 }
  0xbf   : > { %1104 = vst [vmem:[%s1639_s25 + $0x440] sm:$0xff] %v848_v49  ;;  %v359_v49 = vld [vmem:[%s1604_s5 + $0x518] sm:$0xff]  ;;  %v616_v54 = vmul.f32 %v1611_v1, %v358_v46  ;;  %v872_v59 = vadd.f32 %v1616_v5, %v614_v48 }
  0xc0   : > { %1105 = vst [vmem:[%s1639_s25 + $0x448] sm:$0xff] %v849_v52  ;;  %v360_v52 = vld [vmem:[%s1604_s5 + $0x520] sm:$0xff]  ;;  %v617_v57 = vmul.f32 %v1611_v1, %v359_v49  ;;  %v873_v62 = vadd.f32 %v1616_v5, %v615_v51 }
  0xc1   : > { %1106 = vst [vmem:[%s1639_s25 + $0x450] sm:$0xff] %v850_v55  ;;  %v361_v55 = vld [vmem:[%s1604_s5 + $0x528] sm:$0xff]  ;;  %v618_v60 = vmul.f32 %v1611_v1, %v360_v52  ;;  %v874_v2 = vadd.f32 %v1616_v5, %v616_v54 }
  0xc2   : > { %1107 = vst [vmem:[%s1639_s25 + $0x458] sm:$0xff] %v851_v58  ;;  %v362_v58 = vld [vmem:[%s1604_s5 + $0x530] sm:$0xff]  ;;  %v619_v63 = vmul.f32 %v1611_v1, %v361_v55  ;;  %v875_v6 = vadd.f32 %v1616_v5, %v617_v57 }
  0xc3   : > { %1108 = vst [vmem:[%s1639_s25 + $0x460] sm:$0xff] %v852_v61  ;;  %v363_v61 = vld [vmem:[%s1604_s5 + $0x538] sm:$0xff]  ;;  %v620_v3 = vmul.f32 %v1611_v1, %v362_v58  ;;  %v876_v9 = vadd.f32 %v1616_v5, %v618_v60 }
  0xc4   : > { %1109 = vst [vmem:[%s1639_s25 + $0x468] sm:$0xff] %v853_v0  ;;  %v364_v0 = vld [vmem:[%s1604_s5 + $0x540] sm:$0xff]  ;;  %v621_v7 = vmul.f32 %v1611_v1, %v363_v61  ;;  %v877_v12 = vadd.f32 %v1616_v5, %v619_v63 }
  0xc5   : > { %1110 = vst [vmem:[%s1639_s25 + $0x470] sm:$0xff] %v854_v4  ;;  %v365_v4 = vld [vmem:[%s1604_s5 + $0x548] sm:$0xff]  ;;  %v622_v10 = vmul.f32 %v1611_v1, %v364_v0  ;;  %v878_v15 = vadd.f32 %v1616_v5, %v620_v3 }
  0xc6   : > { %1111 = vst [vmem:[%s1639_s25 + $0x478] sm:$0xff] %v855_v8  ;;  %v366_v8 = vld [vmem:[%s1604_s5 + $0x550] sm:$0xff]  ;;  %v623_v13 = vmul.f32 %v1611_v1, %v365_v4  ;;  %v879_v18 = vadd.f32 %v1616_v5, %v621_v7 }
  0xc7   : > { %1112 = vst [vmem:[%s1639_s25 + $0x480] sm:$0xff] %v856_v11  ;;  %v367_v11 = vld [vmem:[%s1604_s5 + $0x558] sm:$0xff]  ;;  %v624_v16 = vmul.f32 %v1611_v1, %v366_v8  ;;  %v880_v21 = vadd.f32 %v1616_v5, %v622_v10 }
  0xc8   : > { %1113 = vst [vmem:[%s1639_s25 + $0x488] sm:$0xff] %v857_v14  ;;  %v368_v14 = vld [vmem:[%s1604_s5 + $0x560] sm:$0xff]  ;;  %v625_v19 = vmul.f32 %v1611_v1, %v367_v11  ;;  %v881_v24 = vadd.f32 %v1616_v5, %v623_v13 }
  0xc9   : > { %1114 = vst [vmem:[%s1639_s25 + $0x490] sm:$0xff] %v858_v17  ;;  %v369_v17 = vld [vmem:[%s1604_s5 + $0x568] sm:$0xff]  ;;  %v626_v22 = vmul.f32 %v1611_v1, %v368_v14  ;;  %v882_v27 = vadd.f32 %v1616_v5, %v624_v16 }
  0xca   : > { %1115 = vst [vmem:[%s1639_s25 + $0x498] sm:$0xff] %v859_v20  ;;  %v370_v20 = vld [vmem:[%s1604_s5 + $0x570] sm:$0xff]  ;;  %v627_v25 = vmul.f32 %v1611_v1, %v369_v17  ;;  %v883_v30 = vadd.f32 %v1616_v5, %v625_v19 }
  0xcb   : > { %1116 = vst [vmem:[%s1639_s25 + $0x4a0] sm:$0xff] %v860_v23  ;;  %v371_v23 = vld [vmem:[%s1604_s5 + $0x578] sm:$0xff]  ;;  %v628_v28 = vmul.f32 %v1611_v1, %v370_v20  ;;  %v884_v33 = vadd.f32 %v1616_v5, %v626_v22 }
  0xcc   : > { %1117 = vst [vmem:[%s1639_s25 + $0x4a8] sm:$0xff] %v861_v26  ;;  %v372_v26 = vld [vmem:[%s1604_s5 + $0x580] sm:$0xff]  ;;  %v629_v31 = vmul.f32 %v1611_v1, %v371_v23  ;;  %v885_v36 = vadd.f32 %v1616_v5, %v627_v25 }
  0xcd   : > { %1118 = vst [vmem:[%s1639_s25 + $0x4b0] sm:$0xff] %v862_v29  ;;  %v373_v29 = vld [vmem:[%s1604_s5 + $0x588] sm:$0xff]  ;;  %v630_v34 = vmul.f32 %v1611_v1, %v372_v26  ;;  %v886_v39 = vadd.f32 %v1616_v5, %v628_v28 }
  0xce   : > { %1119 = vst [vmem:[%s1639_s25 + $0x4b8] sm:$0xff] %v863_v32  ;;  %v374_v32 = vld [vmem:[%s1604_s5 + $0x590] sm:$0xff]  ;;  %v631_v37 = vmul.f32 %v1611_v1, %v373_v29  ;;  %v887_v42 = vadd.f32 %v1616_v5, %v629_v31 }
  0xcf   : > { %1120 = vst [vmem:[%s1639_s25 + $0x4c0] sm:$0xff] %v864_v35  ;;  %v375_v35 = vld [vmem:[%s1604_s5 + $0x598] sm:$0xff]  ;;  %v632_v40 = vmul.f32 %v1611_v1, %v374_v32  ;;  %v888_v45 = vadd.f32 %v1616_v5, %v630_v34 }
  0xd0   : > { %1121 = vst [vmem:[%s1639_s25 + $0x4c8] sm:$0xff] %v865_v38  ;;  %v376_v38 = vld [vmem:[%s1604_s5 + $0x5a0] sm:$0xff]  ;;  %v633_v43 = vmul.f32 %v1611_v1, %v375_v35  ;;  %v889_v48 = vadd.f32 %v1616_v5, %v631_v37 }
  0xd1   : > { %1122 = vst [vmem:[%s1639_s25 + $0x4d0] sm:$0xff] %v866_v41  ;;  %v377_v41 = vld [vmem:[%s1604_s5 + $0x5a8] sm:$0xff]  ;;  %v634_v46 = vmul.f32 %v1611_v1, %v376_v38  ;;  %v890_v51 = vadd.f32 %v1616_v5, %v632_v40 }
  0xd2   : > { %1123 = vst [vmem:[%s1639_s25 + $0x4d8] sm:$0xff] %v867_v44  ;;  %v378_v44 = vld [vmem:[%s1604_s5 + $0x5b0] sm:$0xff]  ;;  %v635_v49 = vmul.f32 %v1611_v1, %v377_v41  ;;  %v891_v54 = vadd.f32 %v1616_v5, %v633_v43 }
  0xd3   : > { %1124 = vst [vmem:[%s1639_s25 + $0x4e0] sm:$0xff] %v868_v47  ;;  %v379_v47 = vld [vmem:[%s1604_s5 + $0x5b8] sm:$0xff]  ;;  %v636_v52 = vmul.f32 %v1611_v1, %v378_v44  ;;  %v892_v57 = vadd.f32 %v1616_v5, %v634_v46 }
  0xd4   : > { %1125 = vst [vmem:[%s1639_s25 + $0x4e8] sm:$0xff] %v869_v50  ;;  %v380_v50 = vld [vmem:[%s1604_s5 + $0x5c0] sm:$0xff]  ;;  %v637_v55 = vmul.f32 %v1611_v1, %v379_v47  ;;  %v893_v60 = vadd.f32 %v1616_v5, %v635_v49 }
  0xd5   : > { %1126 = vst [vmem:[%s1639_s25 + $0x4f0] sm:$0xff] %v870_v53  ;;  %v381_v53 = vld [vmem:[%s1604_s5 + $0x5c8] sm:$0xff]  ;;  %v638_v58 = vmul.f32 %v1611_v1, %v380_v50  ;;  %v894_v63 = vadd.f32 %v1616_v5, %v636_v52 }
  0xd6   : > { %1127 = vst [vmem:[%s1639_s25 + $0x4f8] sm:$0xff] %v871_v56  ;;  %v382_v56 = vld [vmem:[%s1604_s5 + $0x5d0] sm:$0xff]  ;;  %v639_v61 = vmul.f32 %v1611_v1, %v381_v53  ;;  %v895_v3 = vadd.f32 %v1616_v5, %v637_v55 }
  0xd7   : > { %1128 = vst [vmem:[%s1639_s25 + $0x500] sm:$0xff] %v872_v59  ;;  %v383_v59 = vld [vmem:[%s1604_s5 + $0x5d8] sm:$0xff]  ;;  %v640_v0 = vmul.f32 %v1611_v1, %v382_v56  ;;  %v896_v7 = vadd.f32 %v1616_v5, %v638_v58 }
  0xd8   : > { %1129 = vst [vmem:[%s1639_s25 + $0x508] sm:$0xff] %v873_v62  ;;  %v384_v62 = vld [vmem:[%s1604_s5 + $0x5e0] sm:$0xff]  ;;  %v641_v4 = vmul.f32 %v1611_v1, %v383_v59  ;;  %v897_v10 = vadd.f32 %v1616_v5, %v639_v61 }
  0xd9   : > { %1130 = vst [vmem:[%s1639_s25 + $0x510] sm:$0xff] %v874_v2  ;;  %v385_v2 = vld [vmem:[%s1604_s5 + $0x5e8] sm:$0xff]  ;;  %v642_v8 = vmul.f32 %v1611_v1, %v384_v62  ;;  %v898_v13 = vadd.f32 %v1616_v5, %v640_v0 }
  0xda   : > { %1131 = vst [vmem:[%s1639_s25 + $0x518] sm:$0xff] %v875_v6  ;;  %v386_v6 = vld [vmem:[%s1604_s5 + $0x5f0] sm:$0xff]  ;;  %v643_v11 = vmul.f32 %v1611_v1, %v385_v2  ;;  %v899_v16 = vadd.f32 %v1616_v5, %v641_v4 }
  0xdb   : > { %1132 = vst [vmem:[%s1639_s25 + $0x520] sm:$0xff] %v876_v9  ;;  %v387_v9 = vld [vmem:[%s1604_s5 + $0x5f8] sm:$0xff]  ;;  %v644_v14 = vmul.f32 %v1611_v1, %v386_v6  ;;  %v900_v19 = vadd.f32 %v1616_v5, %v642_v8 }
  0xdc   : > { %1133 = vst [vmem:[%s1639_s25 + $0x528] sm:$0xff] %v877_v12  ;;  %v388_v12 = vld [vmem:[%s1604_s5 + $0x600] sm:$0xff]  ;;  %v645_v17 = vmul.f32 %v1611_v1, %v387_v9  ;;  %v901_v22 = vadd.f32 %v1616_v5, %v643_v11 }
  0xdd   : > { %1134 = vst [vmem:[%s1639_s25 + $0x530] sm:$0xff] %v878_v15  ;;  %v389_v15 = vld [vmem:[%s1604_s5 + $0x608] sm:$0xff]  ;;  %v646_v20 = vmul.f32 %v1611_v1, %v388_v12  ;;  %v902_v25 = vadd.f32 %v1616_v5, %v644_v14 }
  0xde   : > { %1135 = vst [vmem:[%s1639_s25 + $0x538] sm:$0xff] %v879_v18  ;;  %v390_v18 = vld [vmem:[%s1604_s5 + $0x610] sm:$0xff]  ;;  %v647_v23 = vmul.f32 %v1611_v1, %v389_v15  ;;  %v903_v28 = vadd.f32 %v1616_v5, %v645_v17 }
  0xdf   : > { %1136 = vst [vmem:[%s1639_s25 + $0x540] sm:$0xff] %v880_v21  ;;  %v391_v21 = vld [vmem:[%s1604_s5 + $0x618] sm:$0xff]  ;;  %v648_v26 = vmul.f32 %v1611_v1, %v390_v18  ;;  %v904_v31 = vadd.f32 %v1616_v5, %v646_v20 }
  0xe0   : > { %1137 = vst [vmem:[%s1639_s25 + $0x548] sm:$0xff] %v881_v24  ;;  %v392_v24 = vld [vmem:[%s1604_s5 + $0x620] sm:$0xff]  ;;  %v649_v29 = vmul.f32 %v1611_v1, %v391_v21  ;;  %v905_v34 = vadd.f32 %v1616_v5, %v647_v23 }
  0xe1   : > { %1138 = vst [vmem:[%s1639_s25 + $0x550] sm:$0xff] %v882_v27  ;;  %v393_v27 = vld [vmem:[%s1604_s5 + $0x628] sm:$0xff]  ;;  %v650_v32 = vmul.f32 %v1611_v1, %v392_v24  ;;  %v906_v37 = vadd.f32 %v1616_v5, %v648_v26 }
  0xe2   : > { %1139 = vst [vmem:[%s1639_s25 + $0x558] sm:$0xff] %v883_v30  ;;  %v394_v30 = vld [vmem:[%s1604_s5 + $0x630] sm:$0xff]  ;;  %v651_v35 = vmul.f32 %v1611_v1, %v393_v27  ;;  %v907_v40 = vadd.f32 %v1616_v5, %v649_v29 }
  0xe3   : > { %1140 = vst [vmem:[%s1639_s25 + $0x560] sm:$0xff] %v884_v33  ;;  %v395_v33 = vld [vmem:[%s1604_s5 + $0x638] sm:$0xff]  ;;  %v652_v38 = vmul.f32 %v1611_v1, %v394_v30  ;;  %v908_v43 = vadd.f32 %v1616_v5, %v650_v32 }
  0xe4   : > { %1141 = vst [vmem:[%s1639_s25 + $0x568] sm:$0xff] %v885_v36  ;;  %v396_v36 = vld [vmem:[%s1604_s5 + $0x640] sm:$0xff]  ;;  %v653_v41 = vmul.f32 %v1611_v1, %v395_v33  ;;  %v909_v46 = vadd.f32 %v1616_v5, %v651_v35 }
  0xe5   : > { %1142 = vst [vmem:[%s1639_s25 + $0x570] sm:$0xff] %v886_v39  ;;  %v397_v39 = vld [vmem:[%s1604_s5 + $0x648] sm:$0xff]  ;;  %v654_v44 = vmul.f32 %v1611_v1, %v396_v36  ;;  %v910_v49 = vadd.f32 %v1616_v5, %v652_v38 }
  0xe6   : > { %1143 = vst [vmem:[%s1639_s25 + $0x578] sm:$0xff] %v887_v42  ;;  %v398_v42 = vld [vmem:[%s1604_s5 + $0x650] sm:$0xff]  ;;  %v655_v47 = vmul.f32 %v1611_v1, %v397_v39  ;;  %v911_v52 = vadd.f32 %v1616_v5, %v653_v41 }
  0xe7   : > { %1144 = vst [vmem:[%s1639_s25 + $0x580] sm:$0xff] %v888_v45  ;;  %v399_v45 = vld [vmem:[%s1604_s5 + $0x658] sm:$0xff]  ;;  %v656_v50 = vmul.f32 %v1611_v1, %v398_v42  ;;  %v912_v55 = vadd.f32 %v1616_v5, %v654_v44 }
  0xe8   : > { %1145 = vst [vmem:[%s1639_s25 + $0x588] sm:$0xff] %v889_v48  ;;  %v400_v48 = vld [vmem:[%s1604_s5 + $0x660] sm:$0xff]  ;;  %v657_v53 = vmul.f32 %v1611_v1, %v399_v45  ;;  %v913_v58 = vadd.f32 %v1616_v5, %v655_v47 }
  0xe9   : > { %1146 = vst [vmem:[%s1639_s25 + $0x590] sm:$0xff] %v890_v51  ;;  %v401_v51 = vld [vmem:[%s1604_s5 + $0x668] sm:$0xff]  ;;  %v658_v56 = vmul.f32 %v1611_v1, %v400_v48  ;;  %v914_v61 = vadd.f32 %v1616_v5, %v656_v50 }
  0xea   : > { %1147 = vst [vmem:[%s1639_s25 + $0x598] sm:$0xff] %v891_v54  ;;  %v402_v54 = vld [vmem:[%s1604_s5 + $0x670] sm:$0xff]  ;;  %v659_v59 = vmul.f32 %v1611_v1, %v401_v51  ;;  %v915_v0 = vadd.f32 %v1616_v5, %v657_v53 }
  0xeb   : > { %1148 = vst [vmem:[%s1639_s25 + $0x5a0] sm:$0xff] %v892_v57  ;;  %v403_v57 = vld [vmem:[%s1604_s5 + $0x678] sm:$0xff]  ;;  %v660_v62 = vmul.f32 %v1611_v1, %v402_v54  ;;  %v916_v4 = vadd.f32 %v1616_v5, %v658_v56 }
  0xec   : > { %1149 = vst [vmem:[%s1639_s25 + $0x5a8] sm:$0xff] %v893_v60  ;;  %v404_v60 = vld [vmem:[%s1604_s5 + $0x680] sm:$0xff]  ;;  %v661_v2 = vmul.f32 %v1611_v1, %v403_v57  ;;  %v917_v8 = vadd.f32 %v1616_v5, %v659_v59 }
  0xed   : > { %1150 = vst [vmem:[%s1639_s25 + $0x5b0] sm:$0xff] %v894_v63  ;;  %v405_v63 = vld [vmem:[%s1604_s5 + $0x688] sm:$0xff]  ;;  %v662_v6 = vmul.f32 %v1611_v1, %v404_v60  ;;  %v918_v11 = vadd.f32 %v1616_v5, %v660_v62 }
  0xee   : > { %1151 = vst [vmem:[%s1639_s25 + $0x5b8] sm:$0xff] %v895_v3  ;;  %v406_v3 = vld [vmem:[%s1604_s5 + $0x690] sm:$0xff]  ;;  %v663_v9 = vmul.f32 %v1611_v1, %v405_v63  ;;  %v919_v14 = vadd.f32 %v1616_v5, %v661_v2 }
  0xef   : > { %1152 = vst [vmem:[%s1639_s25 + $0x5c0] sm:$0xff] %v896_v7  ;;  %v407_v7 = vld [vmem:[%s1604_s5 + $0x698] sm:$0xff]  ;;  %v664_v12 = vmul.f32 %v1611_v1, %v406_v3  ;;  %v920_v17 = vadd.f32 %v1616_v5, %v662_v6 }
  0xf0   : > { %1153 = vst [vmem:[%s1639_s25 + $0x5c8] sm:$0xff] %v897_v10  ;;  %v408_v10 = vld [vmem:[%s1604_s5 + $0x6a0] sm:$0xff]  ;;  %v665_v15 = vmul.f32 %v1611_v1, %v407_v7  ;;  %v921_v20 = vadd.f32 %v1616_v5, %v663_v9 }
  0xf1   : > { %1154 = vst [vmem:[%s1639_s25 + $0x5d0] sm:$0xff] %v898_v13  ;;  %v409_v13 = vld [vmem:[%s1604_s5 + $0x6a8] sm:$0xff]  ;;  %v666_v18 = vmul.f32 %v1611_v1, %v408_v10  ;;  %v922_v23 = vadd.f32 %v1616_v5, %v664_v12 }
  0xf2   : > { %1155 = vst [vmem:[%s1639_s25 + $0x5d8] sm:$0xff] %v899_v16  ;;  %v410_v16 = vld [vmem:[%s1604_s5 + $0x6b0] sm:$0xff]  ;;  %v667_v21 = vmul.f32 %v1611_v1, %v409_v13  ;;  %v923_v26 = vadd.f32 %v1616_v5, %v665_v15 }
  0xf3   : > { %1156 = vst [vmem:[%s1639_s25 + $0x5e0] sm:$0xff] %v900_v19  ;;  %v411_v19 = vld [vmem:[%s1604_s5 + $0x6b8] sm:$0xff]  ;;  %v668_v24 = vmul.f32 %v1611_v1, %v410_v16  ;;  %v924_v29 = vadd.f32 %v1616_v5, %v666_v18 }
  0xf4   : > { %1157 = vst [vmem:[%s1639_s25 + $0x5e8] sm:$0xff] %v901_v22  ;;  %v412_v22 = vld [vmem:[%s1604_s5 + $0x6c0] sm:$0xff]  ;;  %v669_v27 = vmul.f32 %v1611_v1, %v411_v19  ;;  %v925_v32 = vadd.f32 %v1616_v5, %v667_v21 }
  0xf5   : > { %1158 = vst [vmem:[%s1639_s25 + $0x5f0] sm:$0xff] %v902_v25  ;;  %v413_v25 = vld [vmem:[%s1604_s5 + $0x6c8] sm:$0xff]  ;;  %v670_v30 = vmul.f32 %v1611_v1, %v412_v22  ;;  %v926_v35 = vadd.f32 %v1616_v5, %v668_v24 }
  0xf6   : > { %1159 = vst [vmem:[%s1639_s25 + $0x5f8] sm:$0xff] %v903_v28  ;;  %v414_v28 = vld [vmem:[%s1604_s5 + $0x6d0] sm:$0xff]  ;;  %v671_v33 = vmul.f32 %v1611_v1, %v413_v25  ;;  %v927_v38 = vadd.f32 %v1616_v5, %v669_v27 }
  0xf7   : > { %1160 = vst [vmem:[%s1639_s25 + $0x600] sm:$0xff] %v904_v31  ;;  %v415_v31 = vld [vmem:[%s1604_s5 + $0x6d8] sm:$0xff]  ;;  %v672_v36 = vmul.f32 %v1611_v1, %v414_v28  ;;  %v928_v41 = vadd.f32 %v1616_v5, %v670_v30 }
  0xf8   : > { %1161 = vst [vmem:[%s1639_s25 + $0x608] sm:$0xff] %v905_v34  ;;  %v416_v34 = vld [vmem:[%s1604_s5 + $0x6e0] sm:$0xff]  ;;  %v673_v39 = vmul.f32 %v1611_v1, %v415_v31  ;;  %v929_v44 = vadd.f32 %v1616_v5, %v671_v33 }
  0xf9   : > { %1162 = vst [vmem:[%s1639_s25 + $0x610] sm:$0xff] %v906_v37  ;;  %v417_v37 = vld [vmem:[%s1604_s5 + $0x6e8] sm:$0xff]  ;;  %v674_v42 = vmul.f32 %v1611_v1, %v416_v34  ;;  %v930_v47 = vadd.f32 %v1616_v5, %v672_v36 }
  0xfa   : > { %1163 = vst [vmem:[%s1639_s25 + $0x618] sm:$0xff] %v907_v40  ;;  %v418_v40 = vld [vmem:[%s1604_s5 + $0x6f0] sm:$0xff]  ;;  %v675_v45 = vmul.f32 %v1611_v1, %v417_v37  ;;  %v931_v50 = vadd.f32 %v1616_v5, %v673_v39 }
  0xfb   : > { %1164 = vst [vmem:[%s1639_s25 + $0x620] sm:$0xff] %v908_v43  ;;  %v419_v43 = vld [vmem:[%s1604_s5 + $0x6f8] sm:$0xff]  ;;  %v676_v48 = vmul.f32 %v1611_v1, %v418_v40  ;;  %v932_v53 = vadd.f32 %v1616_v5, %v674_v42 }
  0xfc   : > { %1165 = vst [vmem:[%s1639_s25 + $0x628] sm:$0xff] %v909_v46  ;;  %v420_v46 = vld [vmem:[%s1604_s5 + $0x700] sm:$0xff]  ;;  %v677_v51 = vmul.f32 %v1611_v1, %v419_v43  ;;  %v933_v56 = vadd.f32 %v1616_v5, %v675_v45 }
  0xfd   : > { %1166 = vst [vmem:[%s1639_s25 + $0x630] sm:$0xff] %v910_v49  ;;  %v421_v49 = vld [vmem:[%s1604_s5 + $0x708] sm:$0xff]  ;;  %v678_v54 = vmul.f32 %v1611_v1, %v420_v46  ;;  %v934_v59 = vadd.f32 %v1616_v5, %v676_v48 }
  0xfe   : > { %1167 = vst [vmem:[%s1639_s25 + $0x638] sm:$0xff] %v911_v52  ;;  %v422_v52 = vld [vmem:[%s1604_s5 + $0x710] sm:$0xff]  ;;  %v679_v57 = vmul.f32 %v1611_v1, %v421_v49  ;;  %v935_v62 = vadd.f32 %v1616_v5, %v677_v51 }
  0xff   : > { %1168 = vst [vmem:[%s1639_s25 + $0x640] sm:$0xff] %v912_v55  ;;  %v423_v55 = vld [vmem:[%s1604_s5 + $0x718] sm:$0xff]  ;;  %v680_v60 = vmul.f32 %v1611_v1, %v422_v52  ;;  %v936_v2 = vadd.f32 %v1616_v5, %v678_v54 }
 0x100   : > { %1169 = vst [vmem:[%s1639_s25 + $0x648] sm:$0xff] %v913_v58  ;;  %v424_v58 = vld [vmem:[%s1604_s5 + $0x720] sm:$0xff]  ;;  %v681_v63 = vmul.f32 %v1611_v1, %v423_v55  ;;  %v937_v6 = vadd.f32 %v1616_v5, %v679_v57 }
 0x101   : > { %1170 = vst [vmem:[%s1639_s25 + $0x650] sm:$0xff] %v914_v61  ;;  %v425_v61 = vld [vmem:[%s1604_s5 + $0x728] sm:$0xff]  ;;  %v682_v3 = vmul.f32 %v1611_v1, %v424_v58  ;;  %v938_v9 = vadd.f32 %v1616_v5, %v680_v60 }
 0x102   : > { %1171 = vst [vmem:[%s1639_s25 + $0x658] sm:$0xff] %v915_v0  ;;  %v426_v0 = vld [vmem:[%s1604_s5 + $0x730] sm:$0xff]  ;;  %v683_v7 = vmul.f32 %v1611_v1, %v425_v61  ;;  %v939_v12 = vadd.f32 %v1616_v5, %v681_v63 }
 0x103   : > { %1172 = vst [vmem:[%s1639_s25 + $0x660] sm:$0xff] %v916_v4  ;;  %v427_v4 = vld [vmem:[%s1604_s5 + $0x738] sm:$0xff]  ;;  %v684_v10 = vmul.f32 %v1611_v1, %v426_v0  ;;  %v940_v15 = vadd.f32 %v1616_v5, %v682_v3 }
 0x104   : > { %1173 = vst [vmem:[%s1639_s25 + $0x668] sm:$0xff] %v917_v8  ;;  %v428_v8 = vld [vmem:[%s1604_s5 + $0x740] sm:$0xff]  ;;  %v685_v13 = vmul.f32 %v1611_v1, %v427_v4  ;;  %v941_v18 = vadd.f32 %v1616_v5, %v683_v7 }
 0x105   : > { %1174 = vst [vmem:[%s1639_s25 + $0x670] sm:$0xff] %v918_v11  ;;  %v429_v11 = vld [vmem:[%s1604_s5 + $0x748] sm:$0xff]  ;;  %v686_v16 = vmul.f32 %v1611_v1, %v428_v8  ;;  %v942_v21 = vadd.f32 %v1616_v5, %v684_v10 }
 0x106   : > { %1175 = vst [vmem:[%s1639_s25 + $0x678] sm:$0xff] %v919_v14  ;;  %v430_v14 = vld [vmem:[%s1604_s5 + $0x750] sm:$0xff]  ;;  %v687_v19 = vmul.f32 %v1611_v1, %v429_v11  ;;  %v943_v24 = vadd.f32 %v1616_v5, %v685_v13 }
 0x107   : > { %1176 = vst [vmem:[%s1639_s25 + $0x680] sm:$0xff] %v920_v17  ;;  %v431_v17 = vld [vmem:[%s1604_s5 + $0x758] sm:$0xff]  ;;  %v688_v22 = vmul.f32 %v1611_v1, %v430_v14  ;;  %v944_v27 = vadd.f32 %v1616_v5, %v686_v16 }
 0x108   : > { %1177 = vst [vmem:[%s1639_s25 + $0x688] sm:$0xff] %v921_v20  ;;  %v432_v20 = vld [vmem:[%s1604_s5 + $0x760] sm:$0xff]  ;;  %v689_v25 = vmul.f32 %v1611_v1, %v431_v17  ;;  %v945_v30 = vadd.f32 %v1616_v5, %v687_v19 }
 0x109   : > { %1178 = vst [vmem:[%s1639_s25 + $0x690] sm:$0xff] %v922_v23  ;;  %v433_v23 = vld [vmem:[%s1604_s5 + $0x768] sm:$0xff]  ;;  %v690_v28 = vmul.f32 %v1611_v1, %v432_v20  ;;  %v946_v33 = vadd.f32 %v1616_v5, %v688_v22 }
 0x10a   : > { %1179 = vst [vmem:[%s1639_s25 + $0x698] sm:$0xff] %v923_v26  ;;  %v434_v26 = vld [vmem:[%s1604_s5 + $0x770] sm:$0xff]  ;;  %v691_v31 = vmul.f32 %v1611_v1, %v433_v23  ;;  %v947_v36 = vadd.f32 %v1616_v5, %v689_v25 }
 0x10b   : > { %1180 = vst [vmem:[%s1639_s25 + $0x6a0] sm:$0xff] %v924_v29  ;;  %v435_v29 = vld [vmem:[%s1604_s5 + $0x778] sm:$0xff]  ;;  %v692_v34 = vmul.f32 %v1611_v1, %v434_v26  ;;  %v948_v39 = vadd.f32 %v1616_v5, %v690_v28 }
 0x10c   : > { %1181 = vst [vmem:[%s1639_s25 + $0x6a8] sm:$0xff] %v925_v32  ;;  %v436_v32 = vld [vmem:[%s1604_s5 + $0x780] sm:$0xff]  ;;  %v693_v37 = vmul.f32 %v1611_v1, %v435_v29  ;;  %v949_v42 = vadd.f32 %v1616_v5, %v691_v31 }
 0x10d   : > { %1182 = vst [vmem:[%s1639_s25 + $0x6b0] sm:$0xff] %v926_v35  ;;  %v437_v35 = vld [vmem:[%s1604_s5 + $0x788] sm:$0xff]  ;;  %v694_v40 = vmul.f32 %v1611_v1, %v436_v32  ;;  %v950_v45 = vadd.f32 %v1616_v5, %v692_v34 }
 0x10e   : > { %1183 = vst [vmem:[%s1639_s25 + $0x6b8] sm:$0xff] %v927_v38  ;;  %v438_v38 = vld [vmem:[%s1604_s5 + $0x790] sm:$0xff]  ;;  %v695_v43 = vmul.f32 %v1611_v1, %v437_v35  ;;  %v951_v48 = vadd.f32 %v1616_v5, %v693_v37 }
 0x10f   : > { %1184 = vst [vmem:[%s1639_s25 + $0x6c0] sm:$0xff] %v928_v41  ;;  %v439_v41 = vld [vmem:[%s1604_s5 + $0x798] sm:$0xff]  ;;  %v696_v46 = vmul.f32 %v1611_v1, %v438_v38  ;;  %v952_v51 = vadd.f32 %v1616_v5, %v694_v40 }
 0x110   : > { %1185 = vst [vmem:[%s1639_s25 + $0x6c8] sm:$0xff] %v929_v44  ;;  %v440_v44 = vld [vmem:[%s1604_s5 + $0x7a0] sm:$0xff]  ;;  %v697_v49 = vmul.f32 %v1611_v1, %v439_v41  ;;  %v953_v54 = vadd.f32 %v1616_v5, %v695_v43 }
 0x111   : > { %1186 = vst [vmem:[%s1639_s25 + $0x6d0] sm:$0xff] %v930_v47  ;;  %v441_v47 = vld [vmem:[%s1604_s5 + $0x7a8] sm:$0xff]  ;;  %v698_v52 = vmul.f32 %v1611_v1, %v440_v44  ;;  %v954_v57 = vadd.f32 %v1616_v5, %v696_v46 }
 0x112   : > { %1187 = vst [vmem:[%s1639_s25 + $0x6d8] sm:$0xff] %v931_v50  ;;  %v442_v50 = vld [vmem:[%s1604_s5 + $0x7b0] sm:$0xff]  ;;  %v699_v55 = vmul.f32 %v1611_v1, %v441_v47  ;;  %v955_v60 = vadd.f32 %v1616_v5, %v697_v49 }
 0x113   : > { %1188 = vst [vmem:[%s1639_s25 + $0x6e0] sm:$0xff] %v932_v53  ;;  %v443_v53 = vld [vmem:[%s1604_s5 + $0x7b8] sm:$0xff]  ;;  %v700_v58 = vmul.f32 %v1611_v1, %v442_v50  ;;  %v956_v63 = vadd.f32 %v1616_v5, %v698_v52 }
 0x114   : > { %1189 = vst [vmem:[%s1639_s25 + $0x6e8] sm:$0xff] %v933_v56  ;;  %v444_v56 = vld [vmem:[%s1604_s5 + $0x7c0] sm:$0xff]  ;;  %v701_v61 = vmul.f32 %v1611_v1, %v443_v53  ;;  %v957_v3 = vadd.f32 %v1616_v5, %v699_v55 }
 0x115   : > { %1190 = vst [vmem:[%s1639_s25 + $0x6f0] sm:$0xff] %v934_v59  ;;  %v445_v59 = vld [vmem:[%s1604_s5 + $0x7c8] sm:$0xff]  ;;  %v702_v0 = vmul.f32 %v1611_v1, %v444_v56  ;;  %v958_v7 = vadd.f32 %v1616_v5, %v700_v58 }
 0x116   : > { %1191 = vst [vmem:[%s1639_s25 + $0x6f8] sm:$0xff] %v935_v62  ;;  %v446_v62 = vld [vmem:[%s1604_s5 + $0x7d0] sm:$0xff]  ;;  %v703_v4 = vmul.f32 %v1611_v1, %v445_v59  ;;  %v959_v10 = vadd.f32 %v1616_v5, %v701_v61 }
 0x117   : > { %1192 = vst [vmem:[%s1639_s25 + $0x700] sm:$0xff] %v936_v2  ;;  %v447_v2 = vld [vmem:[%s1604_s5 + $0x7d8] sm:$0xff]  ;;  %v704_v8 = vmul.f32 %v1611_v1, %v446_v62  ;;  %v960_v13 = vadd.f32 %v1616_v5, %v702_v0 }
 0x118   : > { %1193 = vst [vmem:[%s1639_s25 + $0x708] sm:$0xff] %v937_v6  ;;  %v448_v6 = vld [vmem:[%s1604_s5 + $0x7e0] sm:$0xff]  ;;  %v705_v11 = vmul.f32 %v1611_v1, %v447_v2  ;;  %v961_v16 = vadd.f32 %v1616_v5, %v703_v4 }
 0x119   : > { %1194 = vst [vmem:[%s1639_s25 + $0x710] sm:$0xff] %v938_v9  ;;  %v449_v9 = vld [vmem:[%s1604_s5 + $0x7e8] sm:$0xff]  ;;  %v706_v14 = vmul.f32 %v1611_v1, %v448_v6 }
 0x11a   : > { %1195 = vst [vmem:[%s1639_s25 + $0x718] sm:$0xff] %v939_v12  ;;  %v450_v12 = vld [vmem:[%s1604_s5 + $0x7f0] sm:$0xff]  ;;  %v707_v17 = vmul.f32 %v1611_v1, %v449_v9  ;;  %v963_v20 = vadd.f32 %v1616_v5, %v705_v11 }
 0x11b   : > { %1196 = vst [vmem:[%s1639_s25 + $0x720] sm:$0xff] %v940_v15  ;;  %v451_v15 = vld [vmem:[%s1604_s5 + $0x7f8] sm:$0xff]  ;;  %v708_v19 = vmul.f32 %v1611_v1, %v450_v12  ;;  %v964_v22 = vadd.f32 %v1616_v5, %v706_v14 }
 0x11c   : > { %1197 = vst [vmem:[%s1639_s25 + $0x728] sm:$0xff] %v941_v18  ;;  %v962_v18 = vadd.f32 %v1616_v5, %v704_v8  ;;  %v965_v23 = vadd.f32 %v1616_v5, %v707_v17 }
 0x11d   : > { %1198 = vst [vmem:[%s1639_s25 + $0x730] sm:$0xff] %v942_v21  ;;  %v709_v21 = vmul.f32 %v1611_v1, %v451_v15 }
 0x11e   : > { %1199 = vst [vmem:[%s1639_s25 + $0x738] sm:$0xff] %v943_v24  ;;  %v966_v24 = vadd.f32 %v1616_v5, %v708_v19 }
 0x11f   : > { %1200 = vst [vmem:[%s1639_s25 + $0x740] sm:$0xff] %v944_v27  ;;  %v967_v25 = vadd.f32 %v1616_v5, %v709_v21 }
 0x120   : > { %1201 = vst [vmem:[%s1639_s25 + $0x748] sm:$0xff] %v945_v30 }
 0x121   : > { %1202 = vst [vmem:[%s1639_s25 + $0x750] sm:$0xff] %v946_v33 }
 0x122   : > { %1203 = vst [vmem:[%s1639_s25 + $0x758] sm:$0xff] %v947_v36 }
 0x123   : > { %1204 = vst [vmem:[%s1639_s25 + $0x760] sm:$0xff] %v948_v39 }
 0x124   : > { %1205 = vst [vmem:[%s1639_s25 + $0x768] sm:$0xff] %v949_v42 }
 0x125   : > { %1206 = vst [vmem:[%s1639_s25 + $0x770] sm:$0xff] %v950_v45 }
 0x126   : > { %1207 = vst [vmem:[%s1639_s25 + $0x778] sm:$0xff] %v951_v48 }
 0x127   : > { %1208 = vst [vmem:[%s1639_s25 + $0x780] sm:$0xff] %v952_v51 }
 0x128   : > { %1209 = vst [vmem:[%s1639_s25 + $0x788] sm:$0xff] %v953_v54 }
 0x129   : > { %1210 = vst [vmem:[%s1639_s25 + $0x790] sm:$0xff] %v954_v57 }
 0x12a   : > { %1211 = vst [vmem:[%s1639_s25 + $0x798] sm:$0xff] %v955_v60 }
 0x12b   : > { %1212 = vst [vmem:[%s1639_s25 + $0x7a0] sm:$0xff] %v956_v63 }
 0x12c   : > { %1213 = vst [vmem:[%s1639_s25 + $0x7a8] sm:$0xff] %v957_v3 }
 0x12d   : > { %1214 = vst [vmem:[%s1639_s25 + $0x7b0] sm:$0xff] %v958_v7 }
 0x12e   : > { %1215 = vst [vmem:[%s1639_s25 + $0x7b8] sm:$0xff] %v959_v10 }
 0x12f   : > { %1216 = vst [vmem:[%s1639_s25 + $0x7c0] sm:$0xff] %v960_v13 }
 0x130   : > { %1217 = vst [vmem:[%s1639_s25 + $0x7c8] sm:$0xff] %v961_v16 }
 0x131   : > { %1218 = vst [vmem:[%s1639_s25 + $0x7d0] sm:$0xff] %v962_v18 }
 0x132   : > { %1219 = vst [vmem:[%s1639_s25 + $0x7d8] sm:$0xff] %v963_v20 }
 0x133   : > { %1220 = vst [vmem:[%s1639_s25 + $0x7e0] sm:$0xff] %v964_v22 }
 0x134   : > { %1221 = vst [vmem:[%s1639_s25 + $0x7e8] sm:$0xff] %v965_v23 }
 0x135   : > { %1222 = vst [vmem:[%s1639_s25 + $0x7f0] sm:$0xff] %v966_v24 }
 0x136   : > { %1223 = vst [vmem:[%s1639_s25 + $0x7f8] sm:$0xff] %v967_v25 }
 0x137   : > { %1441 = shalt.err (!%p1438_p4)
}
 0x138   : > { %s1484_s29 = smov 1024   ;;  %s1485_s30 = smov 64  }
 0x139   : > { %1336 = dma.vmem_to_hbm [thread:$0]  (%p1562_p11), %s1239_s11, 32768, %s1241_s12, %s1225_s13, %s1484_s29, %s1484_s29, %s1485_s30  }
 0x13a PF: > { %s1255_s4 = sand.u32 1, %s1468_s16   ;;  %p2685_p7 = scmp.ge.s32.totalorder %s1480_s19, 2 }
 0x13b   : > { %s1256_s5 = scalar_lea.sflag [#allocation6], %s1255_s4 }
 0x13c   : > { %p1343_p5 = pnand %p2685_p7, %p1566_p12 }
 0x13e   : > { %p1344_p8 = pneg %p1343_p5 }
 0x140   : > { %1463 = dma.done.wait (%p1344_p8), %s1256_s5, 32768  }
 0x141   : > { %1465 = vsyncadd (%p1344_p8), %s1256_s5, 4294934528  ;;  %p18_p10 = scmp.ge.s32.totalorder %s1537_s20, 4   ;;  %s2686_s16 = smov %s1472_s17 }
 0x142   : > { %s2687_s17 = smov %s1476_s18  ;;  %s2688_s18 = smov %s1549_s23 }
 0x143   : > { %s2689_s19 = smov %s1537_s20  ;;  %20 = sbr.rel (!%p18_p10) target bundleno = 8 (0x8), region = 77 }
 0x148   :  { %1262 = vsyncpa [#allocation5], 1 }
 0x149   :  { %1264 = vsyncpa [#allocation5 + $0x1], 1 }
 0x14a   :  { %1265 = vsyncpa [#allocation6], 1 }
 0x14b   :  { %1267 = vsyncpa [#allocation6 + $0x1], 1 }

</bundles_post_ra>
